<compile_context>
chip_gen: v7x
topology: tpu7x:2x2x1
jax: 0.10.0
libtpu: 0.0.40
codegen_flags: <defaults>
</compile_context>

<pallas_src>
import math

import jax
import jax.numpy as jnp
from jax.experimental import pallas as pl
from jax.experimental.pallas import tpu as pltpu


# ---------------------------------------------------------------------------
# Primary path: three bulk HBM->HBM DMAs (no VMEM staging, no grid).
# ---------------------------------------------------------------------------
def _stack_dma_kernel(x1_ref, x2_ref, x3_ref, o_ref, sem):
    # Inputs are (outer, 1, inner) HBM refs; output is (outer, 3, inner) HBM.
    copies = []
    for k, x_ref in enumerate((x1_ref, x2_ref, x3_ref)):
        c = pltpu.make_async_copy(x_ref, o_ref.at[:, pl.ds(k, 1), :], sem.at[k])
        c.start()
        copies.append(c)
    for c in copies:
        c.wait()


def _stack3_dma(x1f, x2f, x3f, outer, inner, dtype, itemsize):
    return pl.pallas_call(
        _stack_dma_kernel,
        out_shape=jax.ShapeDtypeStruct((outer, 3, inner), dtype),
        in_specs=[pl.BlockSpec(memory_space=pl.ANY)] * 3,
        out_specs=pl.BlockSpec(memory_space=pl.ANY),
        scratch_shapes=[pltpu.SemaphoreType.DMA((3,))],
        cost_estimate=pl.CostEstimate(
            flops=0,
            transcendentals=0,
            bytes_accessed=6 * outer * inner * itemsize,
        ),
    )(x1f, x2f, x3f)


# ---------------------------------------------------------------------------
# Fallback: lane-dense tiled VMEM copy (previous, proven structure).
# ---------------------------------------------------------------------------
def _stack_tiled_kernel(x1_ref, x2_ref, x3_ref, o_ref):
    o_ref[0] = x1_ref[...]
    o_ref[1] = x2_ref[...]
    o_ref[2] = x3_ref[...]


def _stack3_tiled(x1, x2, x3, dim, shape, n_elems, itemsize):
    # Lane-dense flattening: largest lane width (multiple of 128, <= 1024)
    # that divides the element count -> unmasked full-width vst.
    cols = None
    for cand in (1024, 512, 256, 128):
        if n_elems % cand == 0:
            cols = cand
            break
    if cols is None:
        return None  # awkward size: caller falls back to jnp.stack
    rows = n_elems // cols
    dtype = x1.dtype

    # dtype-aware native sublane tile (8 for f32, 16 for bf16, 32 for int8).
    sublane = max(8, 32 // itemsize)

    # ~1 MiB per input block -> ~12 MiB live with double buffering: fits the
    # 16 MiB v5e scoped default; explicit vmem_limit gives headroom elsewhere.
    target_block_bytes = 1 << 20
    tm = max(sublane, target_block_bytes // (cols * itemsize))
    tm = min(tm, rows)
    if tm < rows:
        tm = max(sublane, (tm // sublane) * sublane)
        # Prefer a tile that divides rows exactly (no masked edge tile).
        for cand in range(tm, sublane - 1, -sublane):
            if rows % cand == 0:
                tm = cand
                break

    x1f = x1.reshape(rows, cols)
    x2f = x2.reshape(rows, cols)
    x3f = x3.reshape(rows, cols)

    in_spec = pl.BlockSpec((tm, cols), lambda i: (i, 0))
    out_spec = pl.BlockSpec((3, tm, cols), lambda i: (0, i, 0))

    out_flat = pl.pallas_call(
        _stack_tiled_kernel,
        out_shape=jax.ShapeDtypeStruct((3, rows, cols), dtype),
        grid=(pl.cdiv(rows, tm),),
        in_specs=[in_spec, in_spec, in_spec],
        out_specs=out_spec,
        compiler_params=pltpu.CompilerParams(
            dimension_semantics=("parallel",),
            vmem_limit_bytes=48 * 1024 * 1024,
        ),
        cost_estimate=pl.CostEstimate(
            flops=0,
            transcendentals=0,
            bytes_accessed=6 * n_elems * itemsize,
        ),
    )(x1f, x2f, x3f)

    out = out_flat.reshape((3,) + shape)
    if dim != 0:
        # TODO(synk): fold non-zero stack dims into the output BlockSpec layout
        # (only hit when the HBM->HBM DMA path fails to lower).
        out = jnp.moveaxis(out, 0, dim)
    return out


# ---------------------------------------------------------------------------
# Public wrapper == torch.stack([x1, x2, x3], dim)
# ---------------------------------------------------------------------------
def stack3(x1, x2, x3, dim: int = 0, min_pallas_bytes: int = 512 * 1024):
    assert x1.shape == x2.shape == x3.shape
    assert x1.dtype == x2.dtype == x3.dtype
    shape = tuple(x1.shape)
    ndim = len(shape)
    dim = dim % (ndim + 1)  # torch.stack allows dim in [-(ndim+1), ndim]

    n_elems = math.prod(shape) if shape else 1
    itemsize = jnp.dtype(x1.dtype).itemsize

    outer = math.prod(shape[:dim]) if dim > 0 else 1
    inner = n_elems // max(outer, 1)
    out_shape = shape[:dim] + (3,) + shape[dim:]

    # Tiny tensors (or stacking along the last axes with tiny contiguous runs):
    # a standalone kernel is pure overhead and blocks XLA fusion.
    if n_elems * itemsize < min_pallas_bytes or inner < 128:
        return jnp.stack([x1, x2, x3], axis=dim)

    x1f = x1.reshape(outer, 1, inner)
    x2f = x2.reshape(outer, 1, inner)
    x3f = x3.reshape(outer, 1, inner)

    out = None
    try:
        out = _stack3_dma(x1f, x2f, x3f, outer, inner, x1.dtype, itemsize)
    except Exception:
        # HBM->HBM DMA lowering rejected on this backend: fall back to the
        # tiled VMEM copy kernel (eager calls compile immediately, so the
        # exception is catchable here).
        out = None
    if out is not None:
        # (outer, 3, inner) is already the row-major layout of the stacked
        # result -> this reshape is metadata-only (no extra HBM pass).
        return out.reshape(out_shape)

    out = _stack3_tiled(x1, x2, x3, dim, shape, n_elems, itemsize)
    if out is not None:
        return out
    return jnp.stack([x1, x2, x3], axis=dim)


if __name__ == "__main__":
    key = jax.random.PRNGKey(0)
    k1, k2, k3 = jax.random.split(key, 3)

    # 512 KiB per tensor: large enough to take the Pallas DMA path, still a
    # small test shape (batch=2, channels=4, spatial=128).
    shape = (2, 4, 128, 128)
    x1 = jax.random.normal(k1, shape, dtype=jnp.float32)
    x2 = jax.random.normal(k2, shape, dtype=jnp.float32)
    x3 = jax.random.normal(k3, shape, dtype=jnp.float32)

    for d in (0, 1):
        out = jax.block_until_ready(stack3(x1, x2, x3, dim=d))
        ref = jnp.stack([x1, x2, x3], axis=d)
        assert out.shape == ref.shape, (out.shape, ref.shape)
        assert out.dtype == ref.dtype
        assert jnp.array_equal(out, ref), f"mismatch for dim={d}"

    # Small shape from the original test suite: exercises the jnp.stack
    # fallback (kernel overhead would exceed the 8 KiB copy).
    s_shape = (2, 4, 16, 16)
    y1 = jax.random.normal(k1, s_shape, dtype=jnp.float32)
    y2 = jax.random.normal(k2, s_shape, dtype=jnp.float32)
    y3 = jax.random.normal(k3, s_shape, dtype=jnp.float32)
    out_s = jax.block_until_ready(stack3(y1, y2, y3, dim=0))
    assert jnp.array_equal(out_s, jnp.stack([y1, y2, y3], axis=0))

    print("KERNEL_OK")
</pallas_src>

<mosaic_0001>
module attributes {stable_mosaic.version = 11 : i64} {
  func.func @_stack_dma_kernel(%arg0: memref<1x1x131072xf32, #tpu.memory_space<any>>, %arg1: memref<1x1x131072xf32, #tpu.memory_space<any>>, %arg2: memref<1x1x131072xf32, #tpu.memory_space<any>>, %arg3: memref<1x3x131072xf32, #tpu.memory_space<any>>, %arg4: memref<3x!tpu.dma_semaphore, #tpu.memory_space<semaphore_mem>>) attributes {dimension_semantics = [], scalar_prefetch = 0 : i64, scratch_operands = 1 : i64, tpu.core_type = #tpu.core_type<tc>} {
    %c0_i32 = arith.constant 0 : i32
    %c0_i32_0 = arith.constant 0 : i32
    %c0_i32_1 = arith.constant 0 : i32
    %c0_i32_2 = arith.constant 0 : i32
    %0 = tpu.memref_slice %arg3[%c0_i32_0, %c0_i32_1, %c0_i32_2] : memref<1x3x131072xf32, #tpu.memory_space<any>> -> memref<1x1x131072xf32, #tpu.memory_space<any>>
    %1 = tpu.memref_slice %arg4[%c0_i32] : memref<3x!tpu.dma_semaphore, #tpu.memory_space<semaphore_mem>> -> memref<1x!tpu.dma_semaphore, #tpu.memory_space<semaphore_mem>>
    %2 = tpu.memref_squeeze %1 : memref<1x!tpu.dma_semaphore, #tpu.memory_space<semaphore_mem>> -> memref<!tpu.dma_semaphore, #tpu.memory_space<semaphore_mem>>
    tpu.enqueue_dma source(%arg0 : memref<1x1x131072xf32, #tpu.memory_space<any>>) target(%0 : memref<1x1x131072xf32, #tpu.memory_space<any>>) target_semaphore(%2 : memref<!tpu.dma_semaphore, #tpu.memory_space<semaphore_mem>>)
    %c1_i32 = arith.constant 1 : i32
    %c0_i32_3 = arith.constant 0 : i32
    %c1_i32_4 = arith.constant 1 : i32
    %c0_i32_5 = arith.constant 0 : i32
    %3 = tpu.memref_slice %arg3[%c0_i32_3, %c1_i32_4, %c0_i32_5] : memref<1x3x131072xf32, #tpu.memory_space<any>> -> memref<1x1x131072xf32, #tpu.memory_space<any>>
    %4 = tpu.memref_slice %arg4[%c1_i32] : memref<3x!tpu.dma_semaphore, #tpu.memory_space<semaphore_mem>> -> memref<1x!tpu.dma_semaphore, #tpu.memory_space<semaphore_mem>>
    %5 = tpu.memref_squeeze %4 : memref<1x!tpu.dma_semaphore, #tpu.memory_space<semaphore_mem>> -> memref<!tpu.dma_semaphore, #tpu.memory_space<semaphore_mem>>
    tpu.enqueue_dma source(%arg1 : memref<1x1x131072xf32, #tpu.memory_space<any>>) target(%3 : memref<1x1x131072xf32, #tpu.memory_space<any>>) target_semaphore(%5 : memref<!tpu.dma_semaphore, #tpu.memory_space<semaphore_mem>>)
    %c2_i32 = arith.constant 2 : i32
    %c0_i32_6 = arith.constant 0 : i32
    %c2_i32_7 = arith.constant 2 : i32
    %c0_i32_8 = arith.constant 0 : i32
    %6 = tpu.memref_slice %arg3[%c0_i32_6, %c2_i32_7, %c0_i32_8] : memref<1x3x131072xf32, #tpu.memory_space<any>> -> memref<1x1x131072xf32, #tpu.memory_space<any>>
    %7 = tpu.memref_slice %arg4[%c2_i32] : memref<3x!tpu.dma_semaphore, #tpu.memory_space<semaphore_mem>> -> memref<1x!tpu.dma_semaphore, #tpu.memory_space<semaphore_mem>>
    %8 = tpu.memref_squeeze %7 : memref<1x!tpu.dma_semaphore, #tpu.memory_space<semaphore_mem>> -> memref<!tpu.dma_semaphore, #tpu.memory_space<semaphore_mem>>
    tpu.enqueue_dma source(%arg2 : memref<1x1x131072xf32, #tpu.memory_space<any>>) target(%6 : memref<1x1x131072xf32, #tpu.memory_space<any>>) target_semaphore(%8 : memref<!tpu.dma_semaphore, #tpu.memory_space<semaphore_mem>>)
    %c0_i32_9 = arith.constant 0 : i32
    %c0_i32_10 = arith.constant 0 : i32
    %c0_i32_11 = arith.constant 0 : i32
    %c0_i32_12 = arith.constant 0 : i32
    %9 = tpu.memref_slice %arg3[%c0_i32_10, %c0_i32_11, %c0_i32_12] : memref<1x3x131072xf32, #tpu.memory_space<any>> -> memref<1x1x131072xf32, #tpu.memory_space<any>>
    %10 = tpu.memref_slice %arg4[%c0_i32_9] : memref<3x!tpu.dma_semaphore, #tpu.memory_space<semaphore_mem>> -> memref<1x!tpu.dma_semaphore, #tpu.memory_space<semaphore_mem>>
    %11 = tpu.memref_squeeze %10 : memref<1x!tpu.dma_semaphore, #tpu.memory_space<semaphore_mem>> -> memref<!tpu.dma_semaphore, #tpu.memory_space<semaphore_mem>>
    tpu.wait_dma2 semaphore(%11 : memref<!tpu.dma_semaphore, #tpu.memory_space<semaphore_mem>>) src(%arg0 : memref<1x1x131072xf32, #tpu.memory_space<any>>) dst(%9 : memref<1x1x131072xf32, #tpu.memory_space<any>>)
    %c1_i32_13 = arith.constant 1 : i32
    %c0_i32_14 = arith.constant 0 : i32
    %c1_i32_15 = arith.constant 1 : i32
    %c0_i32_16 = arith.constant 0 : i32
    %12 = tpu.memref_slice %arg3[%c0_i32_14, %c1_i32_15, %c0_i32_16] : memref<1x3x131072xf32, #tpu.memory_space<any>> -> memref<1x1x131072xf32, #tpu.memory_space<any>>
    %13 = tpu.memref_slice %arg4[%c1_i32_13] : memref<3x!tpu.dma_semaphore, #tpu.memory_space<semaphore_mem>> -> memref<1x!tpu.dma_semaphore, #tpu.memory_space<semaphore_mem>>
    %14 = tpu.memref_squeeze %13 : memref<1x!tpu.dma_semaphore, #tpu.memory_space<semaphore_mem>> -> memref<!tpu.dma_semaphore, #tpu.memory_space<semaphore_mem>>
    tpu.wait_dma2 semaphore(%14 : memref<!tpu.dma_semaphore, #tpu.memory_space<semaphore_mem>>) src(%arg1 : memref<1x1x131072xf32, #tpu.memory_space<any>>) dst(%12 : memref<1x1x131072xf32, #tpu.memory_space<any>>)
    %c2_i32_17 = arith.constant 2 : i32
    %c0_i32_18 = arith.constant 0 : i32
    %c2_i32_19 = arith.constant 2 : i32
    %c0_i32_20 = arith.constant 0 : i32
    %15 = tpu.memref_slice %arg3[%c0_i32_18, %c2_i32_19, %c0_i32_20] : memref<1x3x131072xf32, #tpu.memory_space<any>> -> memref<1x1x131072xf32, #tpu.memory_space<any>>
    %16 = tpu.memref_slice %arg4[%c2_i32_17] : memref<3x!tpu.dma_semaphore, #tpu.memory_space<semaphore_mem>> -> memref<1x!tpu.dma_semaphore, #tpu.memory_space<semaphore_mem>>
    %17 = tpu.memref_squeeze %16 : memref<1x!tpu.dma_semaphore, #tpu.memory_space<semaphore_mem>> -> memref<!tpu.dma_semaphore, #tpu.memory_space<semaphore_mem>>
    tpu.wait_dma2 semaphore(%17 : memref<!tpu.dma_semaphore, #tpu.memory_space<semaphore_mem>>) src(%arg2 : memref<1x1x131072xf32, #tpu.memory_space<any>>) dst(%15 : memref<1x1x131072xf32, #tpu.memory_space<any>>)
    return
  }
}

module attributes {stable_mosaic.version = 11 : i64} {
  func.func @_stack_tiled_kernel(%arg0: i32, %arg1: memref<128x1024xf32, #tpu.memory_space<vmem>>, %arg2: memref<128x1024xf32, #tpu.memory_space<vmem>>, %arg3: memref<128x1024xf32, #tpu.memory_space<vmem>>, %arg4: memref<3x128x1024xf32, #tpu.memory_space<vmem>>) attributes {dimension_semantics = [#tpu.dimension_semantics<parallel>], iteration_bounds = array<i64: 1>, scalar_prefetch = 0 : i64, scratch_operands = 0 : i64, tpu.core_type = #tpu.core_type<tc>, window_params = [{transform_indices = @transform_0, window_bounds = array<i64: 128, 1024>}, {transform_indices = @transform_1, window_bounds = array<i64: 128, 1024>}, {transform_indices = @transform_2, window_bounds = array<i64: 128, 1024>}, {transform_indices = @transform_3, window_bounds = array<i64: 3, 128, 1024>}]} {
    %c0 = arith.constant 0 : index
    %c0_0 = arith.constant 0 : index
    %0 = vector.load %arg1[%c0, %c0_0] : memref<128x1024xf32, #tpu.memory_space<vmem>>, vector<128x1024xf32>
    %c0_1 = arith.constant 0 : index
    %c0_2 = arith.constant 0 : index
    %c0_3 = arith.constant 0 : index
    %1 = vector.load %arg4[%c0_1, %c0_2, %c0_3] : memref<3x128x1024xf32, #tpu.memory_space<vmem>>, vector<1x128x1024xf32>
    %2 = vector.shape_cast %1 : vector<1x128x1024xf32> to vector<128x1024xf32>
    %3 = vector.shape_cast %0 : vector<128x1024xf32> to vector<1x128x1024xf32>
    tpu.vector_store %arg4[%c0_1, %c0_2, %c0_3], %3 {strides = array<i32>} : memref<3x128x1024xf32, #tpu.memory_space<vmem>>, vector<1x128x1024xf32>,
    %c0_4 = arith.constant 0 : index
    %c0_5 = arith.constant 0 : index
    %4 = vector.load %arg2[%c0_4, %c0_5] : memref<128x1024xf32, #tpu.memory_space<vmem>>, vector<128x1024xf32>
    %c1 = arith.constant 1 : index
    %c0_6 = arith.constant 0 : index
    %c0_7 = arith.constant 0 : index
    %5 = vector.load %arg4[%c1, %c0_6, %c0_7] : memref<3x128x1024xf32, #tpu.memory_space<vmem>>, vector<1x128x1024xf32>
    %6 = vector.shape_cast %5 : vector<1x128x1024xf32> to vector<128x1024xf32>
    %7 = vector.shape_cast %4 : vector<128x1024xf32> to vector<1x128x1024xf32>
    tpu.vector_store %arg4[%c1, %c0_6, %c0_7], %7 {strides = array<i32>} : memref<3x128x1024xf32, #tpu.memory_space<vmem>>, vector<1x128x1024xf32>,
    %c0_8 = arith.constant 0 : index
    %c0_9 = arith.constant 0 : index
    %8 = vector.load %arg3[%c0_8, %c0_9] : memref<128x1024xf32, #tpu.memory_space<vmem>>, vector<128x1024xf32>
    %c2 = arith.constant 2 : index
    %c0_10 = arith.constant 0 : index
    %c0_11 = arith.constant 0 : index
    %9 = vector.load %arg4[%c2, %c0_10, %c0_11] : memref<3x128x1024xf32, #tpu.memory_space<vmem>>, vector<1x128x1024xf32>
    %10 = vector.shape_cast %9 : vector<1x128x1024xf32> to vector<128x1024xf32>
    %11 = vector.shape_cast %8 : vector<128x1024xf32> to vector<1x128x1024xf32>
    tpu.vector_store %arg4[%c2, %c0_10, %c0_11], %11 {strides = array<i32>} : memref<3x128x1024xf32, #tpu.memory_space<vmem>>, vector<1x128x1024xf32>,
    return
  }
  func.func @transform_0(%arg0: i32) -> (i32, i32) {
    %c0_i32 = arith.constant 0 : i32
    %c0_i32_0 = arith.constant 0 : i32
    return %arg0, %c0_i32 : i32, i32
  }
  func.func @transform_1(%arg0: i32) -> (i32, i32) {
    %c0_i32 = arith.constant 0 : i32
    %c0_i32_0 = arith.constant 0 : i32
    return %arg0, %c0_i32 : i32, i32
  }
  func.func @transform_2(%arg0: i32) -> (i32, i32) {
    %c0_i32 = arith.constant 0 : i32
    %c0_i32_0 = arith.constant 0 : i32
    return %arg0, %c0_i32 : i32, i32
  }
  func.func @transform_3(%arg0: i32) -> (i32, i32, i32) {
    %c0_i32 = arith.constant 0 : i32
    %c0_i32_0 = arith.constant 0 : i32
    %c0_i32_1 = arith.constant 0 : i32
    return %c0_i32, %arg0, %c0_i32_0 : i32, i32, i32
  }
}

</mosaic_0001>

<bundles_post_ra>
// kernel: tpu_custom_call.1
= control target key start
LH: loop header
LB: loop body
LE: loop exit
PB: predicated region body
PF: predicated region fallthrough
CT: control target
= control target key end

     0   :  { %s225_s0 = inlined_call_operand.hbm [shape: f32[1,1,131072], index: 0, kind: input, shape index: {}]   ;;  %s226_s3 = inlined_call_operand.vmem [shape: f32[1,3,131072], index: 3, kind: output, shape index: {}]   ;;  %s227_s1 = inlined_call_operand.hbm [shape: f32[1,1,131072], index: 1, kind: input, shape index: {}]   ;;  %s228_s2 = inlined_call_operand.hbm [shape: f32[1,1,131072], index: 2, kind: input, shape index: {}]  }
   0x1   :  { %s9_s14 = sshll.u32 %s226_s3, 4  ;;  %s13_s17 = scalar_lea.vmem %s226_s3, 1  ;;  %s159_s14 = int_to_ptr.vmem [resolvable:$true] %s9_s14 }
   0x2   :  { %s61_s20 = scalar_lea.hbm %s225_s0, 16384 }
   0x3   :  { %p62_p0 = scmp.ne.s32.totalorder %s225_s0, %s61_s20  ;;  %p65_p1 = scmp.lt.u32.totalorder %s61_s20, %s225_s0 }
   0x5   :  { %p67_p2 = pnand %p65_p1, %p62_p0 }
   0x7   :  { %70 = shalt.err (!%p67_p2)  }
   0x8   :  { %s71_s25 = scalar_lea.vmem %s159_s14, 16384  ;;  %s176_s26 = scalar_lea.vmem %s159_s14, 65536 }
   0x9   :  { %p72_p3 = scmp.ne.s32.totalorder %s159_s14, %s71_s25  ;;  %p76_p4 = scmp.lt.s32.totalorder %s159_s14, %s159_s14 }
   0xa   :  { %p77_p5 = scmp.lt.s32.totalorder %s176_s26, %s71_s25 }
   0xc   :  { %p78_p6 = por %p77_p5, %p76_p4 }
   0xe   :  { %p79_p7 = pnand %p78_p6, %p72_p3 }
  0x10   :  { %82 = shalt.err (!%p79_p7)  }
  0x11   :  { %s133_s27 = smov 16   ;;  %s134_s28 = smov 64  }
  0x12   :  { %s135_s29 = smov 1   ;;  %s16_s5 = sshll.u32 %s13_s17, 4  ;;  %s17_s5 = int_to_ptr.vmem [resolvable:$true] %s16_s5 }
  0x13   :  { %12 = dma.hbm_to_vmem [thread:$0]  %s225_s0, 16384, %s159_s14, [#allocation2], %s133_s27, %s134_s28, %s135_s29 }
  0x14   :  { %s20_s8 = scalar_lea.vmem %s226_s3, 2  ;;  %s83_s12 = scalar_lea.hbm %s227_s1, 16384 }
  0x15   :  { %s23_s9 = sshll.u32 %s20_s8, 4  ;;  %p84_p8 = scmp.ne.s32.totalorder %s227_s1, %s83_s12  ;;  %s24_s9 = int_to_ptr.vmem [resolvable:$true] %s23_s9 }
  0x16   :  { %p87_p9 = scmp.lt.u32.totalorder %s83_s12, %s227_s1 }
  0x18   :  { %p89_p10 = pnand %p87_p9, %p84_p8 }
  0x1a   :  { %92 = shalt.err (!%p89_p10)  }
  0x1b   :  { %s93_s0 = scalar_lea.vmem %s17_s5, 16384  ;;  %p98_p12 = scmp.lt.s32.totalorder %s17_s5, %s159_s14 }
  0x1c   :  { %p94_p11 = scmp.ne.s32.totalorder %s17_s5, %s93_s0  ;;  %p99_p13 = scmp.lt.s32.totalorder %s176_s26, %s93_s0 }
  0x1e   :  { %p100_p0 = por %p99_p13, %p98_p12 }
  0x20   :  { %p101_p1 = pnand %p100_p0, %p94_p11 }
  0x22   :  { %104 = shalt.err (!%p101_p1)  }
  0x23   :  { %19 = dma.hbm_to_vmem [thread:$0]  %s227_s1, 16384, %s17_s5, [#allocation2 + $0x1], %s133_s27, %s134_s28, %s135_s29 }
  0x24   :  { %s105_s21 = scalar_lea.hbm %s228_s2, 16384 }
  0x25   :  { %p106_p2 = scmp.ne.s32.totalorder %s228_s2, %s105_s21  ;;  %p109_p3 = scmp.lt.u32.totalorder %s105_s21, %s228_s2 }
  0x27   :  { %p111_p4 = pnand %p109_p3, %p106_p2 }
  0x29   :  { %114 = shalt.err (!%p111_p4)  }
  0x2a   :  { %s115_s30 = scalar_lea.vmem %s24_s9, 16384  ;;  %p120_p6 = scmp.lt.s32.totalorder %s24_s9, %s159_s14 }
  0x2b   :  { %p116_p5 = scmp.ne.s32.totalorder %s24_s9, %s115_s30  ;;  %p121_p7 = scmp.lt.s32.totalorder %s176_s26, %s115_s30 }
  0x2d   :  { %p122_p8 = por %p121_p7, %p120_p6 }
  0x2f   :  { %p123_p9 = pnand %p122_p8, %p116_p5 }
  0x31   :  { %126 = shalt.err (!%p123_p9)  }
  0x32   :  { %26 = dma.hbm_to_vmem [thread:$0]  %s228_s2, 16384, %s24_s9, [#allocation2 + $0x2], %s133_s27, %s134_s28, %s135_s29 }
  0x33   :  { %127 = dma.done.wait [#allocation2], 16384 }
  0x34   :  { %128 = vsyncadd [#allocation2], 4294950912 }
  0x35   :  { %129 = dma.done.wait [#allocation2 + $0x1], 16384 }
  0x36   :  { %130 = vsyncadd [#allocation2 + $0x1], 4294950912 }
  0x37   :  { %131 = dma.done.wait [#allocation2 + $0x2], 16384 }
  0x38   :  { %132 = vsyncadd [#allocation2 + $0x2], 4294950912 }
  0x39   :  { %35 = vsyncmov [#allocation2] }
  0x3c   :  { %s36_s5 = vpop.sfrf %35 }
  0x3d   :  { %p55_p10 = scmp.ne.s32.totalorder %s36_s5, 0 }
  0x3f   :  { %40 = shalt.err (%p55_p10)  }
  0x40   :  { %42 = vsyncmov [#allocation2 + $0x1] }
  0x43   :  { %s43_s14 = vpop.sfrf %42 }
  0x44   :  { %p56_p11 = scmp.ne.s32.totalorder %s43_s14, 0 }
  0x46   :  { %47 = shalt.err (%p56_p11)  }
  0x47   :  { %49 = vsyncmov [#allocation2 + $0x2] }
  0x4a   :  { %s50_s26 = vpop.sfrf %49 }
  0x4b   :  { %p57_p12 = scmp.ne.s32.totalorder %s50_s26, 0 }
  0x4d   :  { %54 = shalt.err (%p57_p12)  }

// kernel: tpu_custom_call.1
= control target key start
LH: loop header
LB: loop body
LE: loop exit
PB: predicated region body
PF: predicated region fallthrough
CT: control target
= control target key end

     0   :  { %8 = vsyncpa [#allocation3], 0  ;;  %s1037_s0 = inlined_call_operand.hbm [shape: f32[128,1024], index: 0, kind: input, shape index: {}]   ;;  %s1038_s1 = inlined_call_operand.hbm [shape: f32[128,1024], index: 1, kind: input, shape index: {}]   ;;  %s1039_s2 = inlined_call_operand.hbm [shape: f32[128,1024], index: 2, kind: input, shape index: {}]   ;;  %s1040_s3 = inlined_call_operand.hbm [shape: f32[3,128,1024], index: 3, kind: output, shape index: {}]  }
   0x1   :  { %9 = vsyncpa [#allocation6], 0 }
   0x2   :  { %10 = vsyncpa [#allocation4], 0  ;;  %s944_s12 = smov [#allocation5]   ;;  %s945_s14 = smov [#allocation2]  }
   0x3   :  { %s28_s13 = sshll.u32 %s944_s12, 4  ;;  %s16_s15 = sshll.u32 %s945_s14, 4  ;;  %s29_s13 = int_to_ptr.vmem [resolvable:$true] %s28_s13  ;;  %s970_s15 = int_to_ptr.vmem [resolvable:$true] %s16_s15 }
   0x4   :  { %s850_s18 = scalar_lea.hbm %s1038_s1, 16384 }
   0x5   :  { %p851_p0 = scmp.ne.s32.totalorder %s1038_s1, %s850_s18  ;;  %p854_p1 = scmp.lt.u32.totalorder %s850_s18, %s1038_s1 }
   0x7   :  { %p856_p2 = pnand %p854_p1, %p851_p0 }
   0x9   :  { %859 = shalt.err (!%p856_p2)
}
   0xa   :  { %s860_s23 = scalar_lea.vmem %s29_s13, 16384  ;;  %p865_p4 = scmp.lt.s32.totalorder %s29_s13, %s29_s13 }
   0xb   :  { %p861_p3 = scmp.ne.s32.totalorder %s29_s13, %s860_s23  ;;  %p866_p5 = scmp.lt.s32.totalorder %s860_s23, %s860_s23 }
   0xd   :  { %p867_p6 = por %p866_p5, %p865_p4 }
   0xf   :  { %p868_p7 = pnand %p867_p6, %p861_p3 }
  0x11   :  { %871 = shalt.err (!%p868_p7)
}
  0x12   :  { %s946_s24 = smov 1024   ;;  %s947_s25 = smov 64  }
  0x13   :  { %34 = dma.hbm_to_vmem [thread:$0]  %s1038_s1, 16384, %s29_s13, [#allocation6], %s946_s24, %s946_s24, %s947_s25  }
  0x14   :  { %s872_s30 = scalar_lea.hbm %s1037_s0, 16384 }
  0x15   :  { %p873_p8 = scmp.ne.s32.totalorder %s1037_s0, %s872_s30  ;;  %p876_p9 = scmp.lt.u32.totalorder %s872_s30, %s1037_s0 }
  0x17   :  { %p878_p10 = pnand %p876_p9, %p873_p8 }
  0x19   :  { %881 = shalt.err (!%p878_p10)
}
  0x1a   :  { %s882_s8 = scalar_lea.vmem %s970_s15, 16384  ;;  %p887_p12 = scmp.lt.s32.totalorder %s970_s15, %s970_s15 }
  0x1b   :  { %p883_p11 = scmp.ne.s32.totalorder %s970_s15, %s882_s8  ;;  %p888_p13 = scmp.lt.s32.totalorder %s882_s8, %s882_s8 }
  0x1d   :  { %p889_p0 = por %p888_p13, %p887_p12 }
  0x1f   :  { %p890_p1 = pnand %p889_p0, %p883_p11 }
  0x21   :  { %893 = shalt.err (!%p890_p1)
}
  0x22   :  { %22 = dma.hbm_to_vmem [thread:$0]  %s1037_s0, 16384, %s970_s15, [#allocation3], %s946_s24, %s946_s24, %s947_s25  }
  0x23   :  { %s948_s10 = smov [#allocation7]   ;;  %s894_s14 = scalar_lea.hbm %s1039_s2, 16384 }
  0x24   :  { %s40_s11 = sshll.u32 %s948_s10, 4  ;;  %p895_p2 = scmp.ne.s32.totalorder %s1039_s2, %s894_s14  ;;  %s41_s11 = int_to_ptr.vmem [resolvable:$true] %s40_s11 }
  0x25   :  { %p898_p3 = scmp.lt.u32.totalorder %s894_s14, %s1039_s2 }
  0x27   :  { %p900_p4 = pnand %p898_p3, %p895_p2 }
  0x29   :  { %903 = shalt.err (!%p900_p4)
}
  0x2a   :  { %s904_s20 = scalar_lea.vmem %s41_s11, 16384  ;;  %p909_p6 = scmp.lt.s32.totalorder %s41_s11, %s41_s11 }
  0x2b   :  { %p905_p5 = scmp.ne.s32.totalorder %s41_s11, %s904_s20  ;;  %p910_p7 = scmp.lt.s32.totalorder %s904_s20, %s904_s20 }
  0x2d   :  { %p911_p8 = por %p910_p7, %p909_p6 }
  0x2f   :  { %p912_p9 = pnand %p911_p8, %p905_p5 }
  0x31   :  { %915 = shalt.err (!%p912_p9)
}
  0x32   :  { %46 = dma.hbm_to_vmem [thread:$0]  %s1039_s2, 16384, %s41_s11, [#allocation6], %s946_s24, %s946_s24, %s947_s25  }
  0x33   :  { %938 = dma.done.wait [#allocation3], 16384  }
  0x34   :  { %939 = vsyncadd [#allocation3], 4294950912 }
  0x35   :  { %940 = dma.done.wait [#allocation6], 32768  }
  0x36   :  { %941 = vsyncadd [#allocation6], 4294934528  ;;  %v56_v0 = vld [vmem:[#allocation2] sm:$0xff]  ;;  %v57_v1 = vld [vmem:[#allocation2 + $0x8] sm:$0xff]  ;;  %s949_s2 = smov [#allocation8]  }
  0x37   :  { %v58_v2 = vld [vmem:[#allocation2 + $0x10] sm:$0xff]  ;;  %184 = vst [vmem:[#allocation8] sm:$0xff] %v56_v0  ;;  %185 = vst [vmem:[#allocation8 + $0x8] sm:$0xff] %v57_v1  ;;  %v59_v3 = vld [vmem:[#allocation2 + $0x18] sm:$0xff]  ;;  %s831_s21 = sshll.u32 %s949_s2, 4  ;;  %s832_s21 = int_to_ptr.vmem [resolvable:$true] %s831_s21 }
  0x38   :  { %186 = vst [vmem:[#allocation8 + $0x10] sm:$0xff] %v58_v2  ;;  %v60_v4 = vld [vmem:[#allocation2 + $0x20] sm:$0xff]  ;;  %v61_v5 = vld [vmem:[#allocation2 + $0x28] sm:$0xff]  ;;  %187 = vst [vmem:[#allocation8 + $0x18] sm:$0xff] %v59_v3  ;;  %s916_s22 = scalar_lea.vmem %s832_s21, 49152  ;;  %p921_p11 = scmp.lt.s32.totalorder %s832_s21, %s832_s21 }
  0x39   :  { %188 = vst [vmem:[#allocation8 + $0x20] sm:$0xff] %v60_v4  ;;  %189 = vst [vmem:[#allocation8 + $0x28] sm:$0xff] %v61_v5  ;;  %v62_v6 = vld [vmem:[#allocation2 + $0x30] sm:$0xff]  ;;  %v63_v7 = vld [vmem:[#allocation2 + $0x38] sm:$0xff]  ;;  %p917_p10 = scmp.ne.s32.totalorder %s832_s21, %s916_s22  ;;  %p922_p12 = scmp.lt.s32.totalorder %s916_s22, %s916_s22 }
  0x3a   :  { %v64_v8 = vld [vmem:[#allocation2 + $0x40] sm:$0xff]  ;;  %190 = vst [vmem:[#allocation8 + $0x30] sm:$0xff] %v62_v6  ;;  %191 = vst [vmem:[#allocation8 + $0x38] sm:$0xff] %v63_v7  ;;  %v65_v9 = vld [vmem:[#allocation2 + $0x48] sm:$0xff] }
  0x3b   :  { %192 = vst [vmem:[#allocation8 + $0x40] sm:$0xff] %v64_v8  ;;  %v66_v10 = vld [vmem:[#allocation2 + $0x50] sm:$0xff]  ;;  %v67_v11 = vld [vmem:[#allocation2 + $0x58] sm:$0xff]  ;;  %193 = vst [vmem:[#allocation8 + $0x48] sm:$0xff] %v65_v9  ;;  %p923_p13 = por %p922_p12, %p921_p11 }
  0x3c   :  { %194 = vst [vmem:[#allocation8 + $0x50] sm:$0xff] %v66_v10  ;;  %195 = vst [vmem:[#allocation8 + $0x58] sm:$0xff] %v67_v11  ;;  %v68_v12 = vld [vmem:[#allocation2 + $0x60] sm:$0xff]  ;;  %v69_v13 = vld [vmem:[#allocation2 + $0x68] sm:$0xff] }
  0x3d   :  { %v70_v14 = vld [vmem:[#allocation2 + $0x70] sm:$0xff]  ;;  %196 = vst [vmem:[#allocation8 + $0x60] sm:$0xff] %v68_v12  ;;  %197 = vst [vmem:[#allocation8 + $0x68] sm:$0xff] %v69_v13  ;;  %v71_v15 = vld [vmem:[#allocation2 + $0x78] sm:$0xff]  ;;  %p924_p0 = pnand %p923_p13, %p917_p10 }
  0x3e   :  { %198 = vst [vmem:[#allocation8 + $0x70] sm:$0xff] %v70_v14  ;;  %v72_v16 = vld [vmem:[#allocation2 + $0x80] sm:$0xff]  ;;  %v73_v17 = vld [vmem:[#allocation2 + $0x88] sm:$0xff]  ;;  %199 = vst [vmem:[#allocation8 + $0x78] sm:$0xff] %v71_v15 }
  0x3f   :  { %200 = vst [vmem:[#allocation8 + $0x80] sm:$0xff] %v72_v16  ;;  %201 = vst [vmem:[#allocation8 + $0x88] sm:$0xff] %v73_v17  ;;  %v74_v18 = vld [vmem:[#allocation2 + $0x90] sm:$0xff]  ;;  %v75_v19 = vld [vmem:[#allocation2 + $0x98] sm:$0xff] }
  0x40   :  { %v76_v20 = vld [vmem:[#allocation2 + $0xa0] sm:$0xff]  ;;  %202 = vst [vmem:[#allocation8 + $0x90] sm:$0xff] %v74_v18  ;;  %203 = vst [vmem:[#allocation8 + $0x98] sm:$0xff] %v75_v19  ;;  %v77_v21 = vld [vmem:[#allocation2 + $0xa8] sm:$0xff] }
  0x41   :  { %204 = vst [vmem:[#allocation8 + $0xa0] sm:$0xff] %v76_v20  ;;  %v78_v22 = vld [vmem:[#allocation2 + $0xb0] sm:$0xff]  ;;  %v79_v23 = vld [vmem:[#allocation2 + $0xb8] sm:$0xff]  ;;  %205 = vst [vmem:[#allocation8 + $0xa8] sm:$0xff] %v77_v21 }
  0x42   :  { %206 = vst [vmem:[#allocation8 + $0xb0] sm:$0xff] %v78_v22  ;;  %207 = vst [vmem:[#allocation8 + $0xb8] sm:$0xff] %v79_v23  ;;  %v80_v24 = vld [vmem:[#allocation2 + $0xc0] sm:$0xff]  ;;  %v81_v25 = vld [vmem:[#allocation2 + $0xc8] sm:$0xff] }
  0x43   :  { %v82_v26 = vld [vmem:[#allocation2 + $0xd0] sm:$0xff]  ;;  %208 = vst [vmem:[#allocation8 + $0xc0] sm:$0xff] %v80_v24  ;;  %209 = vst [vmem:[#allocation8 + $0xc8] sm:$0xff] %v81_v25  ;;  %v83_v27 = vld [vmem:[#allocation2 + $0xd8] sm:$0xff] }
  0x44   :  { %210 = vst [vmem:[#allocation8 + $0xd0] sm:$0xff] %v82_v26  ;;  %v84_v28 = vld [vmem:[#allocation2 + $0xe0] sm:$0xff]  ;;  %v85_v29 = vld [vmem:[#allocation2 + $0xe8] sm:$0xff]  ;;  %211 = vst [vmem:[#allocation8 + $0xd8] sm:$0xff] %v83_v27 }
  0x45   :  { %212 = vst [vmem:[#allocation8 + $0xe0] sm:$0xff] %v84_v28  ;;  %213 = vst [vmem:[#allocation8 + $0xe8] sm:$0xff] %v85_v29  ;;  %v86_v30 = vld [vmem:[#allocation2 + $0xf0] sm:$0xff]  ;;  %v87_v31 = vld [vmem:[#allocation2 + $0xf8] sm:$0xff] }
  0x46   :  { %v88_v32 = vld [vmem:[#allocation2 + $0x100] sm:$0xff]  ;;  %214 = vst [vmem:[#allocation8 + $0xf0] sm:$0xff] %v86_v30  ;;  %215 = vst [vmem:[#allocation8 + $0xf8] sm:$0xff] %v87_v31  ;;  %v89_v33 = vld [vmem:[#allocation2 + $0x108] sm:$0xff] }
  0x47   :  { %216 = vst [vmem:[#allocation8 + $0x100] sm:$0xff] %v88_v32  ;;  %v90_v34 = vld [vmem:[#allocation2 + $0x110] sm:$0xff]  ;;  %v91_v35 = vld [vmem:[#allocation2 + $0x118] sm:$0xff]  ;;  %217 = vst [vmem:[#allocation8 + $0x108] sm:$0xff] %v89_v33 }
  0x48   :  { %218 = vst [vmem:[#allocation8 + $0x110] sm:$0xff] %v90_v34  ;;  %219 = vst [vmem:[#allocation8 + $0x118] sm:$0xff] %v91_v35  ;;  %v92_v36 = vld [vmem:[#allocation2 + $0x120] sm:$0xff]  ;;  %v93_v37 = vld [vmem:[#allocation2 + $0x128] sm:$0xff] }
  0x49   :  { %v94_v38 = vld [vmem:[#allocation2 + $0x130] sm:$0xff]  ;;  %220 = vst [vmem:[#allocation8 + $0x120] sm:$0xff] %v92_v36  ;;  %221 = vst [vmem:[#allocation8 + $0x128] sm:$0xff] %v93_v37  ;;  %v95_v39 = vld [vmem:[#allocation2 + $0x138] sm:$0xff] }
  0x4a   :  { %222 = vst [vmem:[#allocation8 + $0x130] sm:$0xff] %v94_v38  ;;  %v96_v40 = vld [vmem:[#allocation2 + $0x140] sm:$0xff]  ;;  %v97_v41 = vld [vmem:[#allocation2 + $0x148] sm:$0xff]  ;;  %223 = vst [vmem:[#allocation8 + $0x138] sm:$0xff] %v95_v39 }
  0x4b   :  { %224 = vst [vmem:[#allocation8 + $0x140] sm:$0xff] %v96_v40  ;;  %225 = vst [vmem:[#allocation8 + $0x148] sm:$0xff] %v97_v41  ;;  %v98_v42 = vld [vmem:[#allocation2 + $0x150] sm:$0xff]  ;;  %v99_v43 = vld [vmem:[#allocation2 + $0x158] sm:$0xff] }
  0x4c   :  { %v100_v44 = vld [vmem:[#allocation2 + $0x160] sm:$0xff]  ;;  %226 = vst [vmem:[#allocation8 + $0x150] sm:$0xff] %v98_v42  ;;  %227 = vst [vmem:[#allocation8 + $0x158] sm:$0xff] %v99_v43  ;;  %v101_v45 = vld [vmem:[#allocation2 + $0x168] sm:$0xff] }
  0x4d   :  { %228 = vst [vmem:[#allocation8 + $0x160] sm:$0xff] %v100_v44  ;;  %v102_v46 = vld [vmem:[#allocation2 + $0x170] sm:$0xff]  ;;  %v103_v47 = vld [vmem:[#allocation2 + $0x178] sm:$0xff]  ;;  %229 = vst [vmem:[#allocation8 + $0x168] sm:$0xff] %v101_v45 }
  0x4e   :  { %230 = vst [vmem:[#allocation8 + $0x170] sm:$0xff] %v102_v46  ;;  %231 = vst [vmem:[#allocation8 + $0x178] sm:$0xff] %v103_v47  ;;  %v104_v48 = vld [vmem:[#allocation2 + $0x180] sm:$0xff]  ;;  %v105_v49 = vld [vmem:[#allocation2 + $0x188] sm:$0xff] }
  0x4f   :  { %v106_v50 = vld [vmem:[#allocation2 + $0x190] sm:$0xff]  ;;  %232 = vst [vmem:[#allocation8 + $0x180] sm:$0xff] %v104_v48  ;;  %233 = vst [vmem:[#allocation8 + $0x188] sm:$0xff] %v105_v49  ;;  %v107_v51 = vld [vmem:[#allocation2 + $0x198] sm:$0xff] }
  0x50   :  { %234 = vst [vmem:[#allocation8 + $0x190] sm:$0xff] %v106_v50  ;;  %v108_v52 = vld [vmem:[#allocation2 + $0x1a0] sm:$0xff]  ;;  %v109_v53 = vld [vmem:[#allocation2 + $0x1a8] sm:$0xff]  ;;  %235 = vst [vmem:[#allocation8 + $0x198] sm:$0xff] %v107_v51 }
  0x51   :  { %236 = vst [vmem:[#allocation8 + $0x1a0] sm:$0xff] %v108_v52  ;;  %237 = vst [vmem:[#allocation8 + $0x1a8] sm:$0xff] %v109_v53  ;;  %v110_v54 = vld [vmem:[#allocation2 + $0x1b0] sm:$0xff]  ;;  %v111_v55 = vld [vmem:[#allocation2 + $0x1b8] sm:$0xff] }
  0x52   :  { %v112_v56 = vld [vmem:[#allocation2 + $0x1c0] sm:$0xff]  ;;  %238 = vst [vmem:[#allocation8 + $0x1b0] sm:$0xff] %v110_v54  ;;  %239 = vst [vmem:[#allocation8 + $0x1b8] sm:$0xff] %v111_v55  ;;  %v113_v57 = vld [vmem:[#allocation2 + $0x1c8] sm:$0xff] }
  0x53   :  { %240 = vst [vmem:[#allocation8 + $0x1c0] sm:$0xff] %v112_v56  ;;  %v114_v58 = vld [vmem:[#allocation2 + $0x1d0] sm:$0xff]  ;;  %v115_v59 = vld [vmem:[#allocation2 + $0x1d8] sm:$0xff]  ;;  %241 = vst [vmem:[#allocation8 + $0x1c8] sm:$0xff] %v113_v57 }
  0x54   :  { %242 = vst [vmem:[#allocation8 + $0x1d0] sm:$0xff] %v114_v58  ;;  %243 = vst [vmem:[#allocation8 + $0x1d8] sm:$0xff] %v115_v59  ;;  %v116_v60 = vld [vmem:[#allocation2 + $0x1e0] sm:$0xff]  ;;  %v117_v61 = vld [vmem:[#allocation2 + $0x1e8] sm:$0xff] }
  0x55   :  { %v118_v62 = vld [vmem:[#allocation2 + $0x1f0] sm:$0xff]  ;;  %244 = vst [vmem:[#allocation8 + $0x1e0] sm:$0xff] %v116_v60  ;;  %245 = vst [vmem:[#allocation8 + $0x1e8] sm:$0xff] %v117_v61  ;;  %v119_v63 = vld [vmem:[#allocation2 + $0x1f8] sm:$0xff] }
  0x56   :  { %246 = vst [vmem:[#allocation8 + $0x1f0] sm:$0xff] %v118_v62  ;;  %v120_v0 = vld [vmem:[#allocation2 + $0x200] sm:$0xff]  ;;  %v121_v1 = vld [vmem:[#allocation2 + $0x208] sm:$0xff]  ;;  %247 = vst [vmem:[#allocation8 + $0x1f8] sm:$0xff] %v119_v63 }
  0x57   :  { %248 = vst [vmem:[#allocation8 + $0x200] sm:$0xff] %v120_v0  ;;  %249 = vst [vmem:[#allocation8 + $0x208] sm:$0xff] %v121_v1  ;;  %v122_v2 = vld [vmem:[#allocation2 + $0x210] sm:$0xff]  ;;  %v123_v3 = vld [vmem:[#allocation2 + $0x218] sm:$0xff] }
  0x58   :  { %v124_v4 = vld [vmem:[#allocation2 + $0x220] sm:$0xff]  ;;  %250 = vst [vmem:[#allocation8 + $0x210] sm:$0xff] %v122_v2  ;;  %251 = vst [vmem:[#allocation8 + $0x218] sm:$0xff] %v123_v3  ;;  %v125_v5 = vld [vmem:[#allocation2 + $0x228] sm:$0xff] }
  0x59   :  { %252 = vst [vmem:[#allocation8 + $0x220] sm:$0xff] %v124_v4  ;;  %v126_v6 = vld [vmem:[#allocation2 + $0x230] sm:$0xff]  ;;  %v127_v7 = vld [vmem:[#allocation2 + $0x238] sm:$0xff]  ;;  %253 = vst [vmem:[#allocation8 + $0x228] sm:$0xff] %v125_v5 }
  0x5a   :  { %254 = vst [vmem:[#allocation8 + $0x230] sm:$0xff] %v126_v6  ;;  %255 = vst [vmem:[#allocation8 + $0x238] sm:$0xff] %v127_v7  ;;  %v128_v8 = vld [vmem:[#allocation2 + $0x240] sm:$0xff]  ;;  %v129_v9 = vld [vmem:[#allocation2 + $0x248] sm:$0xff] }
  0x5b   :  { %v130_v10 = vld [vmem:[#allocation2 + $0x250] sm:$0xff]  ;;  %256 = vst [vmem:[#allocation8 + $0x240] sm:$0xff] %v128_v8  ;;  %257 = vst [vmem:[#allocation8 + $0x248] sm:$0xff] %v129_v9  ;;  %v131_v11 = vld [vmem:[#allocation2 + $0x258] sm:$0xff] }
  0x5c   :  { %258 = vst [vmem:[#allocation8 + $0x250] sm:$0xff] %v130_v10  ;;  %v132_v12 = vld [vmem:[#allocation2 + $0x260] sm:$0xff]  ;;  %v133_v13 = vld [vmem:[#allocation2 + $0x268] sm:$0xff]  ;;  %259 = vst [vmem:[#allocation8 + $0x258] sm:$0xff] %v131_v11 }
  0x5d   :  { %260 = vst [vmem:[#allocation8 + $0x260] sm:$0xff] %v132_v12  ;;  %261 = vst [vmem:[#allocation8 + $0x268] sm:$0xff] %v133_v13  ;;  %v134_v14 = vld [vmem:[#allocation2 + $0x270] sm:$0xff]  ;;  %v135_v15 = vld [vmem:[#allocation2 + $0x278] sm:$0xff] }
  0x5e   :  { %v136_v16 = vld [vmem:[#allocation2 + $0x280] sm:$0xff]  ;;  %262 = vst [vmem:[#allocation8 + $0x270] sm:$0xff] %v134_v14  ;;  %263 = vst [vmem:[#allocation8 + $0x278] sm:$0xff] %v135_v15  ;;  %v137_v17 = vld [vmem:[#allocation2 + $0x288] sm:$0xff] }
  0x5f   :  { %264 = vst [vmem:[#allocation8 + $0x280] sm:$0xff] %v136_v16  ;;  %v138_v18 = vld [vmem:[#allocation2 + $0x290] sm:$0xff]  ;;  %v139_v19 = vld [vmem:[#allocation2 + $0x298] sm:$0xff]  ;;  %265 = vst [vmem:[#allocation8 + $0x288] sm:$0xff] %v137_v17 }
  0x60   :  { %266 = vst [vmem:[#allocation8 + $0x290] sm:$0xff] %v138_v18  ;;  %267 = vst [vmem:[#allocation8 + $0x298] sm:$0xff] %v139_v19  ;;  %v140_v20 = vld [vmem:[#allocation2 + $0x2a0] sm:$0xff]  ;;  %v141_v21 = vld [vmem:[#allocation2 + $0x2a8] sm:$0xff] }
  0x61   :  { %v142_v22 = vld [vmem:[#allocation2 + $0x2b0] sm:$0xff]  ;;  %268 = vst [vmem:[#allocation8 + $0x2a0] sm:$0xff] %v140_v20  ;;  %269 = vst [vmem:[#allocation8 + $0x2a8] sm:$0xff] %v141_v21  ;;  %v143_v23 = vld [vmem:[#allocation2 + $0x2b8] sm:$0xff] }
  0x62   :  { %270 = vst [vmem:[#allocation8 + $0x2b0] sm:$0xff] %v142_v22  ;;  %v144_v24 = vld [vmem:[#allocation2 + $0x2c0] sm:$0xff]  ;;  %v145_v25 = vld [vmem:[#allocation2 + $0x2c8] sm:$0xff]  ;;  %271 = vst [vmem:[#allocation8 + $0x2b8] sm:$0xff] %v143_v23 }
  0x63   :  { %272 = vst [vmem:[#allocation8 + $0x2c0] sm:$0xff] %v144_v24  ;;  %273 = vst [vmem:[#allocation8 + $0x2c8] sm:$0xff] %v145_v25  ;;  %v146_v26 = vld [vmem:[#allocation2 + $0x2d0] sm:$0xff]  ;;  %v147_v27 = vld [vmem:[#allocation2 + $0x2d8] sm:$0xff] }
  0x64   :  { %v148_v28 = vld [vmem:[#allocation2 + $0x2e0] sm:$0xff]  ;;  %274 = vst [vmem:[#allocation8 + $0x2d0] sm:$0xff] %v146_v26  ;;  %275 = vst [vmem:[#allocation8 + $0x2d8] sm:$0xff] %v147_v27  ;;  %v149_v29 = vld [vmem:[#allocation2 + $0x2e8] sm:$0xff] }
  0x65   :  { %276 = vst [vmem:[#allocation8 + $0x2e0] sm:$0xff] %v148_v28  ;;  %v150_v30 = vld [vmem:[#allocation2 + $0x2f0] sm:$0xff]  ;;  %v151_v31 = vld [vmem:[#allocation2 + $0x2f8] sm:$0xff]  ;;  %277 = vst [vmem:[#allocation8 + $0x2e8] sm:$0xff] %v149_v29 }
  0x66   :  { %278 = vst [vmem:[#allocation8 + $0x2f0] sm:$0xff] %v150_v30  ;;  %279 = vst [vmem:[#allocation8 + $0x2f8] sm:$0xff] %v151_v31  ;;  %v152_v32 = vld [vmem:[#allocation2 + $0x300] sm:$0xff]  ;;  %v153_v33 = vld [vmem:[#allocation2 + $0x308] sm:$0xff] }
  0x67   :  { %v154_v34 = vld [vmem:[#allocation2 + $0x310] sm:$0xff]  ;;  %280 = vst [vmem:[#allocation8 + $0x300] sm:$0xff] %v152_v32  ;;  %281 = vst [vmem:[#allocation8 + $0x308] sm:$0xff] %v153_v33  ;;  %v155_v35 = vld [vmem:[#allocation2 + $0x318] sm:$0xff] }
  0x68   :  { %282 = vst [vmem:[#allocation8 + $0x310] sm:$0xff] %v154_v34  ;;  %v156_v36 = vld [vmem:[#allocation2 + $0x320] sm:$0xff]  ;;  %v157_v37 = vld [vmem:[#allocation2 + $0x328] sm:$0xff]  ;;  %283 = vst [vmem:[#allocation8 + $0x318] sm:$0xff] %v155_v35 }
  0x69   :  { %284 = vst [vmem:[#allocation8 + $0x320] sm:$0xff] %v156_v36  ;;  %285 = vst [vmem:[#allocation8 + $0x328] sm:$0xff] %v157_v37  ;;  %v158_v38 = vld [vmem:[#allocation2 + $0x330] sm:$0xff]  ;;  %v159_v39 = vld [vmem:[#allocation2 + $0x338] sm:$0xff] }
  0x6a   :  { %v160_v40 = vld [vmem:[#allocation2 + $0x340] sm:$0xff]  ;;  %286 = vst [vmem:[#allocation8 + $0x330] sm:$0xff] %v158_v38  ;;  %287 = vst [vmem:[#allocation8 + $0x338] sm:$0xff] %v159_v39  ;;  %v161_v41 = vld [vmem:[#allocation2 + $0x348] sm:$0xff] }
  0x6b   :  { %288 = vst [vmem:[#allocation8 + $0x340] sm:$0xff] %v160_v40  ;;  %v162_v42 = vld [vmem:[#allocation2 + $0x350] sm:$0xff]  ;;  %v163_v43 = vld [vmem:[#allocation2 + $0x358] sm:$0xff]  ;;  %289 = vst [vmem:[#allocation8 + $0x348] sm:$0xff] %v161_v41 }
  0x6c   :  { %290 = vst [vmem:[#allocation8 + $0x350] sm:$0xff] %v162_v42  ;;  %291 = vst [vmem:[#allocation8 + $0x358] sm:$0xff] %v163_v43  ;;  %v164_v44 = vld [vmem:[#allocation2 + $0x360] sm:$0xff]  ;;  %v165_v45 = vld [vmem:[#allocation2 + $0x368] sm:$0xff] }
  0x6d   :  { %v166_v46 = vld [vmem:[#allocation2 + $0x370] sm:$0xff]  ;;  %292 = vst [vmem:[#allocation8 + $0x360] sm:$0xff] %v164_v44  ;;  %293 = vst [vmem:[#allocation8 + $0x368] sm:$0xff] %v165_v45  ;;  %v167_v47 = vld [vmem:[#allocation2 + $0x378] sm:$0xff] }
  0x6e   :  { %294 = vst [vmem:[#allocation8 + $0x370] sm:$0xff] %v166_v46  ;;  %v168_v48 = vld [vmem:[#allocation2 + $0x380] sm:$0xff]  ;;  %v169_v49 = vld [vmem:[#allocation2 + $0x388] sm:$0xff]  ;;  %295 = vst [vmem:[#allocation8 + $0x378] sm:$0xff] %v167_v47 }
  0x6f   :  { %296 = vst [vmem:[#allocation8 + $0x380] sm:$0xff] %v168_v48  ;;  %297 = vst [vmem:[#allocation8 + $0x388] sm:$0xff] %v169_v49  ;;  %v170_v50 = vld [vmem:[#allocation2 + $0x390] sm:$0xff]  ;;  %v171_v51 = vld [vmem:[#allocation2 + $0x398] sm:$0xff] }
  0x70   :  { %v172_v52 = vld [vmem:[#allocation2 + $0x3a0] sm:$0xff]  ;;  %298 = vst [vmem:[#allocation8 + $0x390] sm:$0xff] %v170_v50  ;;  %299 = vst [vmem:[#allocation8 + $0x398] sm:$0xff] %v171_v51  ;;  %v173_v53 = vld [vmem:[#allocation2 + $0x3a8] sm:$0xff] }
  0x71   :  { %300 = vst [vmem:[#allocation8 + $0x3a0] sm:$0xff] %v172_v52  ;;  %v174_v54 = vld [vmem:[#allocation2 + $0x3b0] sm:$0xff]  ;;  %v175_v55 = vld [vmem:[#allocation2 + $0x3b8] sm:$0xff]  ;;  %301 = vst [vmem:[#allocation8 + $0x3a8] sm:$0xff] %v173_v53 }
  0x72   :  { %302 = vst [vmem:[#allocation8 + $0x3b0] sm:$0xff] %v174_v54  ;;  %303 = vst [vmem:[#allocation8 + $0x3b8] sm:$0xff] %v175_v55  ;;  %v176_v56 = vld [vmem:[#allocation2 + $0x3c0] sm:$0xff]  ;;  %v177_v57 = vld [vmem:[#allocation2 + $0x3c8] sm:$0xff] }
  0x73   :  { %v178_v58 = vld [vmem:[#allocation2 + $0x3d0] sm:$0xff]  ;;  %304 = vst [vmem:[#allocation8 + $0x3c0] sm:$0xff] %v176_v56  ;;  %305 = vst [vmem:[#allocation8 + $0x3c8] sm:$0xff] %v177_v57  ;;  %v179_v59 = vld [vmem:[#allocation2 + $0x3d8] sm:$0xff] }
  0x74   :  { %306 = vst [vmem:[#allocation8 + $0x3d0] sm:$0xff] %v178_v58  ;;  %v180_v60 = vld [vmem:[#allocation2 + $0x3e0] sm:$0xff]  ;;  %v181_v61 = vld [vmem:[#allocation2 + $0x3e8] sm:$0xff]  ;;  %307 = vst [vmem:[#allocation8 + $0x3d8] sm:$0xff] %v179_v59 }
  0x75   :  { %308 = vst [vmem:[#allocation8 + $0x3e0] sm:$0xff] %v180_v60  ;;  %309 = vst [vmem:[#allocation8 + $0x3e8] sm:$0xff] %v181_v61  ;;  %v182_v62 = vld [vmem:[#allocation2 + $0x3f0] sm:$0xff]  ;;  %v183_v63 = vld [vmem:[#allocation2 + $0x3f8] sm:$0xff] }
  0x76   :  { %v312_v0 = vld [vmem:[#allocation5] sm:$0xff]  ;;  %310 = vst [vmem:[#allocation8 + $0x3f0] sm:$0xff] %v182_v62  ;;  %311 = vst [vmem:[#allocation8 + $0x3f8] sm:$0xff] %v183_v63  ;;  %v313_v1 = vld [vmem:[#allocation5 + $0x8] sm:$0xff] }
  0x77   :  { %441 = vst [vmem:[#allocation8 + $0x400] sm:$0xff] %v312_v0  ;;  %v314_v2 = vld [vmem:[#allocation5 + $0x10] sm:$0xff]  ;;  %v315_v3 = vld [vmem:[#allocation5 + $0x18] sm:$0xff]  ;;  %442 = vst [vmem:[#allocation8 + $0x408] sm:$0xff] %v313_v1 }
  0x78   :  { %443 = vst [vmem:[#allocation8 + $0x410] sm:$0xff] %v314_v2  ;;  %444 = vst [vmem:[#allocation8 + $0x418] sm:$0xff] %v315_v3  ;;  %v316_v4 = vld [vmem:[#allocation5 + $0x20] sm:$0xff]  ;;  %v317_v5 = vld [vmem:[#allocation5 + $0x28] sm:$0xff] }
  0x79   :  { %v318_v6 = vld [vmem:[#allocation5 + $0x30] sm:$0xff]  ;;  %445 = vst [vmem:[#allocation8 + $0x420] sm:$0xff] %v316_v4  ;;  %446 = vst [vmem:[#allocation8 + $0x428] sm:$0xff] %v317_v5  ;;  %v319_v7 = vld [vmem:[#allocation5 + $0x38] sm:$0xff] }
  0x7a   :  { %447 = vst [vmem:[#allocation8 + $0x430] sm:$0xff] %v318_v6  ;;  %v320_v8 = vld [vmem:[#allocation5 + $0x40] sm:$0xff]  ;;  %v321_v9 = vld [vmem:[#allocation5 + $0x48] sm:$0xff]  ;;  %448 = vst [vmem:[#allocation8 + $0x438] sm:$0xff] %v319_v7 }
  0x7b   :  { %449 = vst [vmem:[#allocation8 + $0x440] sm:$0xff] %v320_v8  ;;  %450 = vst [vmem:[#allocation8 + $0x448] sm:$0xff] %v321_v9  ;;  %v322_v10 = vld [vmem:[#allocation5 + $0x50] sm:$0xff]  ;;  %v323_v11 = vld [vmem:[#allocation5 + $0x58] sm:$0xff] }
  0x7c   :  { %v324_v12 = vld [vmem:[#allocation5 + $0x60] sm:$0xff]  ;;  %451 = vst [vmem:[#allocation8 + $0x450] sm:$0xff] %v322_v10  ;;  %452 = vst [vmem:[#allocation8 + $0x458] sm:$0xff] %v323_v11  ;;  %v325_v13 = vld [vmem:[#allocation5 + $0x68] sm:$0xff] }
  0x7d   :  { %453 = vst [vmem:[#allocation8 + $0x460] sm:$0xff] %v324_v12  ;;  %v326_v14 = vld [vmem:[#allocation5 + $0x70] sm:$0xff]  ;;  %v327_v15 = vld [vmem:[#allocation5 + $0x78] sm:$0xff]  ;;  %454 = vst [vmem:[#allocation8 + $0x468] sm:$0xff] %v325_v13 }
  0x7e   :  { %455 = vst [vmem:[#allocation8 + $0x470] sm:$0xff] %v326_v14  ;;  %456 = vst [vmem:[#allocation8 + $0x478] sm:$0xff] %v327_v15  ;;  %v328_v16 = vld [vmem:[#allocation5 + $0x80] sm:$0xff]  ;;  %v329_v17 = vld [vmem:[#allocation5 + $0x88] sm:$0xff] }
  0x7f   :  { %v330_v18 = vld [vmem:[#allocation5 + $0x90] sm:$0xff]  ;;  %457 = vst [vmem:[#allocation8 + $0x480] sm:$0xff] %v328_v16  ;;  %458 = vst [vmem:[#allocation8 + $0x488] sm:$0xff] %v329_v17  ;;  %v331_v19 = vld [vmem:[#allocation5 + $0x98] sm:$0xff] }
  0x80   :  { %459 = vst [vmem:[#allocation8 + $0x490] sm:$0xff] %v330_v18  ;;  %v332_v20 = vld [vmem:[#allocation5 + $0xa0] sm:$0xff]  ;;  %v333_v21 = vld [vmem:[#allocation5 + $0xa8] sm:$0xff]  ;;  %460 = vst [vmem:[#allocation8 + $0x498] sm:$0xff] %v331_v19 }
  0x81   :  { %461 = vst [vmem:[#allocation8 + $0x4a0] sm:$0xff] %v332_v20  ;;  %462 = vst [vmem:[#allocation8 + $0x4a8] sm:$0xff] %v333_v21  ;;  %v334_v22 = vld [vmem:[#allocation5 + $0xb0] sm:$0xff]  ;;  %v335_v23 = vld [vmem:[#allocation5 + $0xb8] sm:$0xff] }
  0x82   :  { %v336_v24 = vld [vmem:[#allocation5 + $0xc0] sm:$0xff]  ;;  %463 = vst [vmem:[#allocation8 + $0x4b0] sm:$0xff] %v334_v22  ;;  %464 = vst [vmem:[#allocation8 + $0x4b8] sm:$0xff] %v335_v23  ;;  %v337_v25 = vld [vmem:[#allocation5 + $0xc8] sm:$0xff] }
  0x83   :  { %465 = vst [vmem:[#allocation8 + $0x4c0] sm:$0xff] %v336_v24  ;;  %v338_v26 = vld [vmem:[#allocation5 + $0xd0] sm:$0xff]  ;;  %v339_v27 = vld [vmem:[#allocation5 + $0xd8] sm:$0xff]  ;;  %466 = vst [vmem:[#allocation8 + $0x4c8] sm:$0xff] %v337_v25 }
  0x84   :  { %467 = vst [vmem:[#allocation8 + $0x4d0] sm:$0xff] %v338_v26  ;;  %468 = vst [vmem:[#allocation8 + $0x4d8] sm:$0xff] %v339_v27  ;;  %v340_v28 = vld [vmem:[#allocation5 + $0xe0] sm:$0xff]  ;;  %v341_v29 = vld [vmem:[#allocation5 + $0xe8] sm:$0xff] }
  0x85   :  { %v342_v30 = vld [vmem:[#allocation5 + $0xf0] sm:$0xff]  ;;  %469 = vst [vmem:[#allocation8 + $0x4e0] sm:$0xff] %v340_v28  ;;  %470 = vst [vmem:[#allocation8 + $0x4e8] sm:$0xff] %v341_v29  ;;  %v343_v31 = vld [vmem:[#allocation5 + $0xf8] sm:$0xff] }
  0x86   :  { %471 = vst [vmem:[#allocation8 + $0x4f0] sm:$0xff] %v342_v30  ;;  %v344_v32 = vld [vmem:[#allocation5 + $0x100] sm:$0xff]  ;;  %v345_v33 = vld [vmem:[#allocation5 + $0x108] sm:$0xff]  ;;  %472 = vst [vmem:[#allocation8 + $0x4f8] sm:$0xff] %v343_v31 }
  0x87   :  { %473 = vst [vmem:[#allocation8 + $0x500] sm:$0xff] %v344_v32  ;;  %474 = vst [vmem:[#allocation8 + $0x508] sm:$0xff] %v345_v33  ;;  %v346_v34 = vld [vmem:[#allocation5 + $0x110] sm:$0xff]  ;;  %v347_v35 = vld [vmem:[#allocation5 + $0x118] sm:$0xff] }
  0x88   :  { %v348_v36 = vld [vmem:[#allocation5 + $0x120] sm:$0xff]  ;;  %475 = vst [vmem:[#allocation8 + $0x510] sm:$0xff] %v346_v34  ;;  %476 = vst [vmem:[#allocation8 + $0x518] sm:$0xff] %v347_v35  ;;  %v349_v37 = vld [vmem:[#allocation5 + $0x128] sm:$0xff] }
  0x89   :  { %477 = vst [vmem:[#allocation8 + $0x520] sm:$0xff] %v348_v36  ;;  %v350_v38 = vld [vmem:[#allocation5 + $0x130] sm:$0xff]  ;;  %v351_v39 = vld [vmem:[#allocation5 + $0x138] sm:$0xff]  ;;  %478 = vst [vmem:[#allocation8 + $0x528] sm:$0xff] %v349_v37 }
  0x8a   :  { %479 = vst [vmem:[#allocation8 + $0x530] sm:$0xff] %v350_v38  ;;  %480 = vst [vmem:[#allocation8 + $0x538] sm:$0xff] %v351_v39  ;;  %v352_v40 = vld [vmem:[#allocation5 + $0x140] sm:$0xff]  ;;  %v353_v41 = vld [vmem:[#allocation5 + $0x148] sm:$0xff] }
  0x8b   :  { %v354_v42 = vld [vmem:[#allocation5 + $0x150] sm:$0xff]  ;;  %481 = vst [vmem:[#allocation8 + $0x540] sm:$0xff] %v352_v40  ;;  %482 = vst [vmem:[#allocation8 + $0x548] sm:$0xff] %v353_v41  ;;  %v355_v43 = vld [vmem:[#allocation5 + $0x158] sm:$0xff] }
  0x8c   :  { %483 = vst [vmem:[#allocation8 + $0x550] sm:$0xff] %v354_v42  ;;  %v356_v44 = vld [vmem:[#allocation5 + $0x160] sm:$0xff]  ;;  %v357_v45 = vld [vmem:[#allocation5 + $0x168] sm:$0xff]  ;;  %484 = vst [vmem:[#allocation8 + $0x558] sm:$0xff] %v355_v43 }
  0x8d   :  { %485 = vst [vmem:[#allocation8 + $0x560] sm:$0xff] %v356_v44  ;;  %486 = vst [vmem:[#allocation8 + $0x568] sm:$0xff] %v357_v45  ;;  %v358_v46 = vld [vmem:[#allocation5 + $0x170] sm:$0xff]  ;;  %v359_v47 = vld [vmem:[#allocation5 + $0x178] sm:$0xff] }
  0x8e   :  { %v360_v48 = vld [vmem:[#allocation5 + $0x180] sm:$0xff]  ;;  %487 = vst [vmem:[#allocation8 + $0x570] sm:$0xff] %v358_v46  ;;  %488 = vst [vmem:[#allocation8 + $0x578] sm:$0xff] %v359_v47  ;;  %v361_v49 = vld [vmem:[#allocation5 + $0x188] sm:$0xff] }
  0x8f   :  { %489 = vst [vmem:[#allocation8 + $0x580] sm:$0xff] %v360_v48  ;;  %v362_v50 = vld [vmem:[#allocation5 + $0x190] sm:$0xff]  ;;  %v363_v51 = vld [vmem:[#allocation5 + $0x198] sm:$0xff]  ;;  %490 = vst [vmem:[#allocation8 + $0x588] sm:$0xff] %v361_v49 }
  0x90   :  { %491 = vst [vmem:[#allocation8 + $0x590] sm:$0xff] %v362_v50  ;;  %492 = vst [vmem:[#allocation8 + $0x598] sm:$0xff] %v363_v51  ;;  %v364_v52 = vld [vmem:[#allocation5 + $0x1a0] sm:$0xff]  ;;  %v365_v53 = vld [vmem:[#allocation5 + $0x1a8] sm:$0xff] }
  0x91   :  { %v366_v54 = vld [vmem:[#allocation5 + $0x1b0] sm:$0xff]  ;;  %493 = vst [vmem:[#allocation8 + $0x5a0] sm:$0xff] %v364_v52  ;;  %494 = vst [vmem:[#allocation8 + $0x5a8] sm:$0xff] %v365_v53  ;;  %v367_v55 = vld [vmem:[#allocation5 + $0x1b8] sm:$0xff] }
  0x92   :  { %495 = vst [vmem:[#allocation8 + $0x5b0] sm:$0xff] %v366_v54  ;;  %v368_v56 = vld [vmem:[#allocation5 + $0x1c0] sm:$0xff]  ;;  %v369_v57 = vld [vmem:[#allocation5 + $0x1c8] sm:$0xff]  ;;  %496 = vst [vmem:[#allocation8 + $0x5b8] sm:$0xff] %v367_v55 }
  0x93   :  { %497 = vst [vmem:[#allocation8 + $0x5c0] sm:$0xff] %v368_v56  ;;  %498 = vst [vmem:[#allocation8 + $0x5c8] sm:$0xff] %v369_v57  ;;  %v370_v58 = vld [vmem:[#allocation5 + $0x1d0] sm:$0xff]  ;;  %v371_v59 = vld [vmem:[#allocation5 + $0x1d8] sm:$0xff] }
  0x94   :  { %v372_v60 = vld [vmem:[#allocation5 + $0x1e0] sm:$0xff]  ;;  %499 = vst [vmem:[#allocation8 + $0x5d0] sm:$0xff] %v370_v58  ;;  %500 = vst [vmem:[#allocation8 + $0x5d8] sm:$0xff] %v371_v59  ;;  %v373_v61 = vld [vmem:[#allocation5 + $0x1e8] sm:$0xff] }
  0x95   :  { %501 = vst [vmem:[#allocation8 + $0x5e0] sm:$0xff] %v372_v60  ;;  %v374_v62 = vld [vmem:[#allocation5 + $0x1f0] sm:$0xff]  ;;  %v375_v63 = vld [vmem:[#allocation5 + $0x1f8] sm:$0xff]  ;;  %502 = vst [vmem:[#allocation8 + $0x5e8] sm:$0xff] %v373_v61 }
  0x96   :  { %503 = vst [vmem:[#allocation8 + $0x5f0] sm:$0xff] %v374_v62  ;;  %504 = vst [vmem:[#allocation8 + $0x5f8] sm:$0xff] %v375_v63  ;;  %v376_v0 = vld [vmem:[#allocation5 + $0x200] sm:$0xff]  ;;  %v377_v1 = vld [vmem:[#allocation5 + $0x208] sm:$0xff] }
  0x97   :  { %v378_v2 = vld [vmem:[#allocation5 + $0x210] sm:$0xff]  ;;  %505 = vst [vmem:[#allocation8 + $0x600] sm:$0xff] %v376_v0  ;;  %506 = vst [vmem:[#allocation8 + $0x608] sm:$0xff] %v377_v1  ;;  %v379_v3 = vld [vmem:[#allocation5 + $0x218] sm:$0xff] }
  0x98   :  { %507 = vst [vmem:[#allocation8 + $0x610] sm:$0xff] %v378_v2  ;;  %v380_v4 = vld [vmem:[#allocation5 + $0x220] sm:$0xff]  ;;  %v381_v5 = vld [vmem:[#allocation5 + $0x228] sm:$0xff]  ;;  %508 = vst [vmem:[#allocation8 + $0x618] sm:$0xff] %v379_v3 }
  0x99   :  { %509 = vst [vmem:[#allocation8 + $0x620] sm:$0xff] %v380_v4  ;;  %510 = vst [vmem:[#allocation8 + $0x628] sm:$0xff] %v381_v5  ;;  %v382_v6 = vld [vmem:[#allocation5 + $0x230] sm:$0xff]  ;;  %v383_v7 = vld [vmem:[#allocation5 + $0x238] sm:$0xff] }
  0x9a   :  { %v384_v8 = vld [vmem:[#allocation5 + $0x240] sm:$0xff]  ;;  %511 = vst [vmem:[#allocation8 + $0x630] sm:$0xff] %v382_v6  ;;  %512 = vst [vmem:[#allocation8 + $0x638] sm:$0xff] %v383_v7  ;;  %v385_v9 = vld [vmem:[#allocation5 + $0x248] sm:$0xff] }
  0x9b   :  { %513 = vst [vmem:[#allocation8 + $0x640] sm:$0xff] %v384_v8  ;;  %v386_v10 = vld [vmem:[#allocation5 + $0x250] sm:$0xff]  ;;  %v387_v11 = vld [vmem:[#allocation5 + $0x258] sm:$0xff]  ;;  %514 = vst [vmem:[#allocation8 + $0x648] sm:$0xff] %v385_v9 }
  0x9c   :  { %515 = vst [vmem:[#allocation8 + $0x650] sm:$0xff] %v386_v10  ;;  %516 = vst [vmem:[#allocation8 + $0x658] sm:$0xff] %v387_v11  ;;  %v388_v12 = vld [vmem:[#allocation5 + $0x260] sm:$0xff]  ;;  %v389_v13 = vld [vmem:[#allocation5 + $0x268] sm:$0xff] }
  0x9d   :  { %v390_v14 = vld [vmem:[#allocation5 + $0x270] sm:$0xff]  ;;  %517 = vst [vmem:[#allocation8 + $0x660] sm:$0xff] %v388_v12  ;;  %518 = vst [vmem:[#allocation8 + $0x668] sm:$0xff] %v389_v13  ;;  %v391_v15 = vld [vmem:[#allocation5 + $0x278] sm:$0xff] }
  0x9e   :  { %519 = vst [vmem:[#allocation8 + $0x670] sm:$0xff] %v390_v14  ;;  %v392_v16 = vld [vmem:[#allocation5 + $0x280] sm:$0xff]  ;;  %v393_v17 = vld [vmem:[#allocation5 + $0x288] sm:$0xff]  ;;  %520 = vst [vmem:[#allocation8 + $0x678] sm:$0xff] %v391_v15 }
  0x9f   :  { %521 = vst [vmem:[#allocation8 + $0x680] sm:$0xff] %v392_v16  ;;  %522 = vst [vmem:[#allocation8 + $0x688] sm:$0xff] %v393_v17  ;;  %v394_v18 = vld [vmem:[#allocation5 + $0x290] sm:$0xff]  ;;  %v395_v19 = vld [vmem:[#allocation5 + $0x298] sm:$0xff] }
  0xa0   :  { %v396_v20 = vld [vmem:[#allocation5 + $0x2a0] sm:$0xff]  ;;  %523 = vst [vmem:[#allocation8 + $0x690] sm:$0xff] %v394_v18  ;;  %524 = vst [vmem:[#allocation8 + $0x698] sm:$0xff] %v395_v19  ;;  %v397_v21 = vld [vmem:[#allocation5 + $0x2a8] sm:$0xff] }
  0xa1   :  { %525 = vst [vmem:[#allocation8 + $0x6a0] sm:$0xff] %v396_v20  ;;  %v398_v22 = vld [vmem:[#allocation5 + $0x2b0] sm:$0xff]  ;;  %v399_v23 = vld [vmem:[#allocation5 + $0x2b8] sm:$0xff]  ;;  %526 = vst [vmem:[#allocation8 + $0x6a8] sm:$0xff] %v397_v21 }
  0xa2   :  { %527 = vst [vmem:[#allocation8 + $0x6b0] sm:$0xff] %v398_v22  ;;  %528 = vst [vmem:[#allocation8 + $0x6b8] sm:$0xff] %v399_v23  ;;  %v400_v24 = vld [vmem:[#allocation5 + $0x2c0] sm:$0xff]  ;;  %v401_v25 = vld [vmem:[#allocation5 + $0x2c8] sm:$0xff] }
  0xa3   :  { %v402_v26 = vld [vmem:[#allocation5 + $0x2d0] sm:$0xff]  ;;  %529 = vst [vmem:[#allocation8 + $0x6c0] sm:$0xff] %v400_v24  ;;  %530 = vst [vmem:[#allocation8 + $0x6c8] sm:$0xff] %v401_v25  ;;  %v403_v27 = vld [vmem:[#allocation5 + $0x2d8] sm:$0xff] }
  0xa4   :  { %531 = vst [vmem:[#allocation8 + $0x6d0] sm:$0xff] %v402_v26  ;;  %v404_v28 = vld [vmem:[#allocation5 + $0x2e0] sm:$0xff]  ;;  %v405_v29 = vld [vmem:[#allocation5 + $0x2e8] sm:$0xff]  ;;  %532 = vst [vmem:[#allocation8 + $0x6d8] sm:$0xff] %v403_v27 }
  0xa5   :  { %533 = vst [vmem:[#allocation8 + $0x6e0] sm:$0xff] %v404_v28  ;;  %534 = vst [vmem:[#allocation8 + $0x6e8] sm:$0xff] %v405_v29  ;;  %v406_v30 = vld [vmem:[#allocation5 + $0x2f0] sm:$0xff]  ;;  %v407_v31 = vld [vmem:[#allocation5 + $0x2f8] sm:$0xff] }
  0xa6   :  { %v408_v32 = vld [vmem:[#allocation5 + $0x300] sm:$0xff]  ;;  %535 = vst [vmem:[#allocation8 + $0x6f0] sm:$0xff] %v406_v30  ;;  %536 = vst [vmem:[#allocation8 + $0x6f8] sm:$0xff] %v407_v31  ;;  %v409_v33 = vld [vmem:[#allocation5 + $0x308] sm:$0xff] }
  0xa7   :  { %537 = vst [vmem:[#allocation8 + $0x700] sm:$0xff] %v408_v32  ;;  %v410_v34 = vld [vmem:[#allocation5 + $0x310] sm:$0xff]  ;;  %v411_v35 = vld [vmem:[#allocation5 + $0x318] sm:$0xff]  ;;  %538 = vst [vmem:[#allocation8 + $0x708] sm:$0xff] %v409_v33 }
  0xa8   :  { %539 = vst [vmem:[#allocation8 + $0x710] sm:$0xff] %v410_v34  ;;  %540 = vst [vmem:[#allocation8 + $0x718] sm:$0xff] %v411_v35  ;;  %v412_v36 = vld [vmem:[#allocation5 + $0x320] sm:$0xff]  ;;  %v413_v37 = vld [vmem:[#allocation5 + $0x328] sm:$0xff] }
  0xa9   :  { %v414_v38 = vld [vmem:[#allocation5 + $0x330] sm:$0xff]  ;;  %541 = vst [vmem:[#allocation8 + $0x720] sm:$0xff] %v412_v36  ;;  %542 = vst [vmem:[#allocation8 + $0x728] sm:$0xff] %v413_v37  ;;  %v415_v39 = vld [vmem:[#allocation5 + $0x338] sm:$0xff] }
  0xaa   :  { %543 = vst [vmem:[#allocation8 + $0x730] sm:$0xff] %v414_v38  ;;  %v416_v40 = vld [vmem:[#allocation5 + $0x340] sm:$0xff]  ;;  %v417_v41 = vld [vmem:[#allocation5 + $0x348] sm:$0xff]  ;;  %544 = vst [vmem:[#allocation8 + $0x738] sm:$0xff] %v415_v39 }
  0xab   :  { %545 = vst [vmem:[#allocation8 + $0x740] sm:$0xff] %v416_v40  ;;  %546 = vst [vmem:[#allocation8 + $0x748] sm:$0xff] %v417_v41  ;;  %v418_v42 = vld [vmem:[#allocation5 + $0x350] sm:$0xff]  ;;  %v419_v43 = vld [vmem:[#allocation5 + $0x358] sm:$0xff] }
  0xac   :  { %v420_v44 = vld [vmem:[#allocation5 + $0x360] sm:$0xff]  ;;  %547 = vst [vmem:[#allocation8 + $0x750] sm:$0xff] %v418_v42  ;;  %548 = vst [vmem:[#allocation8 + $0x758] sm:$0xff] %v419_v43  ;;  %v421_v45 = vld [vmem:[#allocation5 + $0x368] sm:$0xff] }
  0xad   :  { %549 = vst [vmem:[#allocation8 + $0x760] sm:$0xff] %v420_v44  ;;  %v422_v46 = vld [vmem:[#allocation5 + $0x370] sm:$0xff]  ;;  %v423_v47 = vld [vmem:[#allocation5 + $0x378] sm:$0xff]  ;;  %550 = vst [vmem:[#allocation8 + $0x768] sm:$0xff] %v421_v45 }
  0xae   :  { %551 = vst [vmem:[#allocation8 + $0x770] sm:$0xff] %v422_v46  ;;  %552 = vst [vmem:[#allocation8 + $0x778] sm:$0xff] %v423_v47  ;;  %v424_v48 = vld [vmem:[#allocation5 + $0x380] sm:$0xff]  ;;  %v425_v49 = vld [vmem:[#allocation5 + $0x388] sm:$0xff] }
  0xaf   :  { %v426_v50 = vld [vmem:[#allocation5 + $0x390] sm:$0xff]  ;;  %553 = vst [vmem:[#allocation8 + $0x780] sm:$0xff] %v424_v48  ;;  %554 = vst [vmem:[#allocation8 + $0x788] sm:$0xff] %v425_v49  ;;  %v427_v51 = vld [vmem:[#allocation5 + $0x398] sm:$0xff] }
  0xb0   :  { %555 = vst [vmem:[#allocation8 + $0x790] sm:$0xff] %v426_v50  ;;  %v428_v52 = vld [vmem:[#allocation5 + $0x3a0] sm:$0xff]  ;;  %v429_v53 = vld [vmem:[#allocation5 + $0x3a8] sm:$0xff]  ;;  %556 = vst [vmem:[#allocation8 + $0x798] sm:$0xff] %v427_v51 }
  0xb1   :  { %557 = vst [vmem:[#allocation8 + $0x7a0] sm:$0xff] %v428_v52  ;;  %558 = vst [vmem:[#allocation8 + $0x7a8] sm:$0xff] %v429_v53  ;;  %v430_v54 = vld [vmem:[#allocation5 + $0x3b0] sm:$0xff]  ;;  %v431_v55 = vld [vmem:[#allocation5 + $0x3b8] sm:$0xff] }
  0xb2   :  { %v432_v56 = vld [vmem:[#allocation5 + $0x3c0] sm:$0xff]  ;;  %559 = vst [vmem:[#allocation8 + $0x7b0] sm:$0xff] %v430_v54  ;;  %560 = vst [vmem:[#allocation8 + $0x7b8] sm:$0xff] %v431_v55  ;;  %v433_v57 = vld [vmem:[#allocation5 + $0x3c8] sm:$0xff] }
  0xb3   :  { %561 = vst [vmem:[#allocation8 + $0x7c0] sm:$0xff] %v432_v56  ;;  %v434_v58 = vld [vmem:[#allocation5 + $0x3d0] sm:$0xff]  ;;  %v435_v59 = vld [vmem:[#allocation5 + $0x3d8] sm:$0xff]  ;;  %562 = vst [vmem:[#allocation8 + $0x7c8] sm:$0xff] %v433_v57 }
  0xb4   :  { %563 = vst [vmem:[#allocation8 + $0x7d0] sm:$0xff] %v434_v58  ;;  %564 = vst [vmem:[#allocation8 + $0x7d8] sm:$0xff] %v435_v59  ;;  %v436_v60 = vld [vmem:[#allocation5 + $0x3e0] sm:$0xff]  ;;  %v437_v61 = vld [vmem:[#allocation5 + $0x3e8] sm:$0xff] }
  0xb5   :  { %v438_v62 = vld [vmem:[#allocation5 + $0x3f0] sm:$0xff]  ;;  %565 = vst [vmem:[#allocation8 + $0x7e0] sm:$0xff] %v436_v60  ;;  %566 = vst [vmem:[#allocation8 + $0x7e8] sm:$0xff] %v437_v61  ;;  %v439_v63 = vld [vmem:[#allocation5 + $0x3f8] sm:$0xff] }
  0xb6   :  { %567 = vst [vmem:[#allocation8 + $0x7f0] sm:$0xff] %v438_v62  ;;  %v569_v0 = vld [vmem:[#allocation7] sm:$0xff]  ;;  %v570_v1 = vld [vmem:[#allocation7 + $0x8] sm:$0xff]  ;;  %568 = vst [vmem:[#allocation8 + $0x7f8] sm:$0xff] %v439_v63 }
  0xb7   :  { %698 = vst [vmem:[#allocation8 + $0x800] sm:$0xff] %v569_v0  ;;  %699 = vst [vmem:[#allocation8 + $0x808] sm:$0xff] %v570_v1  ;;  %v571_v2 = vld [vmem:[#allocation7 + $0x10] sm:$0xff]  ;;  %v572_v3 = vld [vmem:[#allocation7 + $0x18] sm:$0xff] }
  0xb8   :  { %v573_v4 = vld [vmem:[#allocation7 + $0x20] sm:$0xff]  ;;  %700 = vst [vmem:[#allocation8 + $0x810] sm:$0xff] %v571_v2  ;;  %701 = vst [vmem:[#allocation8 + $0x818] sm:$0xff] %v572_v3  ;;  %v574_v5 = vld [vmem:[#allocation7 + $0x28] sm:$0xff] }
  0xb9   :  { %702 = vst [vmem:[#allocation8 + $0x820] sm:$0xff] %v573_v4  ;;  %v575_v6 = vld [vmem:[#allocation7 + $0x30] sm:$0xff]  ;;  %v576_v7 = vld [vmem:[#allocation7 + $0x38] sm:$0xff]  ;;  %703 = vst [vmem:[#allocation8 + $0x828] sm:$0xff] %v574_v5 }
  0xba   :  { %704 = vst [vmem:[#allocation8 + $0x830] sm:$0xff] %v575_v6  ;;  %705 = vst [vmem:[#allocation8 + $0x838] sm:$0xff] %v576_v7  ;;  %v577_v8 = vld [vmem:[#allocation7 + $0x40] sm:$0xff]  ;;  %v578_v9 = vld [vmem:[#allocation7 + $0x48] sm:$0xff] }
  0xbb   :  { %v579_v10 = vld [vmem:[#allocation7 + $0x50] sm:$0xff]  ;;  %706 = vst [vmem:[#allocation8 + $0x840] sm:$0xff] %v577_v8  ;;  %707 = vst [vmem:[#allocation8 + $0x848] sm:$0xff] %v578_v9  ;;  %v580_v11 = vld [vmem:[#allocation7 + $0x58] sm:$0xff] }
  0xbc   :  { %708 = vst [vmem:[#allocation8 + $0x850] sm:$0xff] %v579_v10  ;;  %v581_v12 = vld [vmem:[#allocation7 + $0x60] sm:$0xff]  ;;  %v582_v13 = vld [vmem:[#allocation7 + $0x68] sm:$0xff]  ;;  %709 = vst [vmem:[#allocation8 + $0x858] sm:$0xff] %v580_v11 }
  0xbd   :  { %710 = vst [vmem:[#allocation8 + $0x860] sm:$0xff] %v581_v12  ;;  %711 = vst [vmem:[#allocation8 + $0x868] sm:$0xff] %v582_v13  ;;  %v583_v14 = vld [vmem:[#allocation7 + $0x70] sm:$0xff]  ;;  %v584_v15 = vld [vmem:[#allocation7 + $0x78] sm:$0xff] }
  0xbe   :  { %v585_v16 = vld [vmem:[#allocation7 + $0x80] sm:$0xff]  ;;  %712 = vst [vmem:[#allocation8 + $0x870] sm:$0xff] %v583_v14  ;;  %713 = vst [vmem:[#allocation8 + $0x878] sm:$0xff] %v584_v15  ;;  %v586_v17 = vld [vmem:[#allocation7 + $0x88] sm:$0xff] }
  0xbf   :  { %714 = vst [vmem:[#allocation8 + $0x880] sm:$0xff] %v585_v16  ;;  %v587_v18 = vld [vmem:[#allocation7 + $0x90] sm:$0xff]  ;;  %v588_v19 = vld [vmem:[#allocation7 + $0x98] sm:$0xff]  ;;  %715 = vst [vmem:[#allocation8 + $0x888] sm:$0xff] %v586_v17 }
  0xc0   :  { %716 = vst [vmem:[#allocation8 + $0x890] sm:$0xff] %v587_v18  ;;  %717 = vst [vmem:[#allocation8 + $0x898] sm:$0xff] %v588_v19  ;;  %v589_v20 = vld [vmem:[#allocation7 + $0xa0] sm:$0xff]  ;;  %v590_v21 = vld [vmem:[#allocation7 + $0xa8] sm:$0xff] }
  0xc1   :  { %v591_v22 = vld [vmem:[#allocation7 + $0xb0] sm:$0xff]  ;;  %718 = vst [vmem:[#allocation8 + $0x8a0] sm:$0xff] %v589_v20  ;;  %719 = vst [vmem:[#allocation8 + $0x8a8] sm:$0xff] %v590_v21  ;;  %v592_v23 = vld [vmem:[#allocation7 + $0xb8] sm:$0xff] }
  0xc2   :  { %720 = vst [vmem:[#allocation8 + $0x8b0] sm:$0xff] %v591_v22  ;;  %v593_v24 = vld [vmem:[#allocation7 + $0xc0] sm:$0xff]  ;;  %v594_v25 = vld [vmem:[#allocation7 + $0xc8] sm:$0xff]  ;;  %721 = vst [vmem:[#allocation8 + $0x8b8] sm:$0xff] %v592_v23 }
  0xc3   :  { %722 = vst [vmem:[#allocation8 + $0x8c0] sm:$0xff] %v593_v24  ;;  %723 = vst [vmem:[#allocation8 + $0x8c8] sm:$0xff] %v594_v25  ;;  %v595_v26 = vld [vmem:[#allocation7 + $0xd0] sm:$0xff]  ;;  %v596_v27 = vld [vmem:[#allocation7 + $0xd8] sm:$0xff] }
  0xc4   :  { %v597_v28 = vld [vmem:[#allocation7 + $0xe0] sm:$0xff]  ;;  %724 = vst [vmem:[#allocation8 + $0x8d0] sm:$0xff] %v595_v26  ;;  %725 = vst [vmem:[#allocation8 + $0x8d8] sm:$0xff] %v596_v27  ;;  %v598_v29 = vld [vmem:[#allocation7 + $0xe8] sm:$0xff] }
  0xc5   :  { %726 = vst [vmem:[#allocation8 + $0x8e0] sm:$0xff] %v597_v28  ;;  %v599_v30 = vld [vmem:[#allocation7 + $0xf0] sm:$0xff]  ;;  %v600_v31 = vld [vmem:[#allocation7 + $0xf8] sm:$0xff]  ;;  %727 = vst [vmem:[#allocation8 + $0x8e8] sm:$0xff] %v598_v29 }
  0xc6   :  { %728 = vst [vmem:[#allocation8 + $0x8f0] sm:$0xff] %v599_v30  ;;  %729 = vst [vmem:[#allocation8 + $0x8f8] sm:$0xff] %v600_v31  ;;  %v601_v32 = vld [vmem:[#allocation7 + $0x100] sm:$0xff]  ;;  %v602_v33 = vld [vmem:[#allocation7 + $0x108] sm:$0xff] }
  0xc7   :  { %v603_v34 = vld [vmem:[#allocation7 + $0x110] sm:$0xff]  ;;  %730 = vst [vmem:[#allocation8 + $0x900] sm:$0xff] %v601_v32  ;;  %731 = vst [vmem:[#allocation8 + $0x908] sm:$0xff] %v602_v33  ;;  %v604_v35 = vld [vmem:[#allocation7 + $0x118] sm:$0xff] }
  0xc8   :  { %732 = vst [vmem:[#allocation8 + $0x910] sm:$0xff] %v603_v34  ;;  %v605_v36 = vld [vmem:[#allocation7 + $0x120] sm:$0xff]  ;;  %v606_v37 = vld [vmem:[#allocation7 + $0x128] sm:$0xff]  ;;  %733 = vst [vmem:[#allocation8 + $0x918] sm:$0xff] %v604_v35 }
  0xc9   :  { %734 = vst [vmem:[#allocation8 + $0x920] sm:$0xff] %v605_v36  ;;  %735 = vst [vmem:[#allocation8 + $0x928] sm:$0xff] %v606_v37  ;;  %v607_v38 = vld [vmem:[#allocation7 + $0x130] sm:$0xff]  ;;  %v608_v39 = vld [vmem:[#allocation7 + $0x138] sm:$0xff] }
  0xca   :  { %v609_v40 = vld [vmem:[#allocation7 + $0x140] sm:$0xff]  ;;  %736 = vst [vmem:[#allocation8 + $0x930] sm:$0xff] %v607_v38  ;;  %737 = vst [vmem:[#allocation8 + $0x938] sm:$0xff] %v608_v39  ;;  %v610_v41 = vld [vmem:[#allocation7 + $0x148] sm:$0xff] }
  0xcb   :  { %738 = vst [vmem:[#allocation8 + $0x940] sm:$0xff] %v609_v40  ;;  %v611_v42 = vld [vmem:[#allocation7 + $0x150] sm:$0xff]  ;;  %v612_v43 = vld [vmem:[#allocation7 + $0x158] sm:$0xff]  ;;  %739 = vst [vmem:[#allocation8 + $0x948] sm:$0xff] %v610_v41 }
  0xcc   :  { %740 = vst [vmem:[#allocation8 + $0x950] sm:$0xff] %v611_v42  ;;  %741 = vst [vmem:[#allocation8 + $0x958] sm:$0xff] %v612_v43  ;;  %v613_v44 = vld [vmem:[#allocation7 + $0x160] sm:$0xff]  ;;  %v614_v45 = vld [vmem:[#allocation7 + $0x168] sm:$0xff] }
  0xcd   :  { %v615_v46 = vld [vmem:[#allocation7 + $0x170] sm:$0xff]  ;;  %742 = vst [vmem:[#allocation8 + $0x960] sm:$0xff] %v613_v44  ;;  %743 = vst [vmem:[#allocation8 + $0x968] sm:$0xff] %v614_v45  ;;  %v616_v47 = vld [vmem:[#allocation7 + $0x178] sm:$0xff] }
  0xce   :  { %744 = vst [vmem:[#allocation8 + $0x970] sm:$0xff] %v615_v46  ;;  %v617_v48 = vld [vmem:[#allocation7 + $0x180] sm:$0xff]  ;;  %v618_v49 = vld [vmem:[#allocation7 + $0x188] sm:$0xff]  ;;  %745 = vst [vmem:[#allocation8 + $0x978] sm:$0xff] %v616_v47 }
  0xcf   :  { %746 = vst [vmem:[#allocation8 + $0x980] sm:$0xff] %v617_v48  ;;  %747 = vst [vmem:[#allocation8 + $0x988] sm:$0xff] %v618_v49  ;;  %v619_v50 = vld [vmem:[#allocation7 + $0x190] sm:$0xff]  ;;  %v620_v51 = vld [vmem:[#allocation7 + $0x198] sm:$0xff] }
  0xd0   :  { %v621_v52 = vld [vmem:[#allocation7 + $0x1a0] sm:$0xff]  ;;  %748 = vst [vmem:[#allocation8 + $0x990] sm:$0xff] %v619_v50  ;;  %749 = vst [vmem:[#allocation8 + $0x998] sm:$0xff] %v620_v51  ;;  %v622_v53 = vld [vmem:[#allocation7 + $0x1a8] sm:$0xff] }
  0xd1   :  { %750 = vst [vmem:[#allocation8 + $0x9a0] sm:$0xff] %v621_v52  ;;  %v623_v54 = vld [vmem:[#allocation7 + $0x1b0] sm:$0xff]  ;;  %v624_v55 = vld [vmem:[#allocation7 + $0x1b8] sm:$0xff]  ;;  %751 = vst [vmem:[#allocation8 + $0x9a8] sm:$0xff] %v622_v53 }
  0xd2   :  { %752 = vst [vmem:[#allocation8 + $0x9b0] sm:$0xff] %v623_v54  ;;  %753 = vst [vmem:[#allocation8 + $0x9b8] sm:$0xff] %v624_v55  ;;  %v625_v56 = vld [vmem:[#allocation7 + $0x1c0] sm:$0xff]  ;;  %v626_v57 = vld [vmem:[#allocation7 + $0x1c8] sm:$0xff] }
  0xd3   :  { %v627_v58 = vld [vmem:[#allocation7 + $0x1d0] sm:$0xff]  ;;  %754 = vst [vmem:[#allocation8 + $0x9c0] sm:$0xff] %v625_v56  ;;  %755 = vst [vmem:[#allocation8 + $0x9c8] sm:$0xff] %v626_v57  ;;  %v628_v59 = vld [vmem:[#allocation7 + $0x1d8] sm:$0xff] }
  0xd4   :  { %756 = vst [vmem:[#allocation8 + $0x9d0] sm:$0xff] %v627_v58  ;;  %v629_v60 = vld [vmem:[#allocation7 + $0x1e0] sm:$0xff]  ;;  %v630_v61 = vld [vmem:[#allocation7 + $0x1e8] sm:$0xff]  ;;  %757 = vst [vmem:[#allocation8 + $0x9d8] sm:$0xff] %v628_v59 }
  0xd5   :  { %758 = vst [vmem:[#allocation8 + $0x9e0] sm:$0xff] %v629_v60  ;;  %759 = vst [vmem:[#allocation8 + $0x9e8] sm:$0xff] %v630_v61  ;;  %v631_v62 = vld [vmem:[#allocation7 + $0x1f0] sm:$0xff]  ;;  %v632_v63 = vld [vmem:[#allocation7 + $0x1f8] sm:$0xff] }
  0xd6   :  { %v633_v0 = vld [vmem:[#allocation7 + $0x200] sm:$0xff]  ;;  %760 = vst [vmem:[#allocation8 + $0x9f0] sm:$0xff] %v631_v62  ;;  %761 = vst [vmem:[#allocation8 + $0x9f8] sm:$0xff] %v632_v63  ;;  %v634_v1 = vld [vmem:[#allocation7 + $0x208] sm:$0xff] }
  0xd7   :  { %762 = vst [vmem:[#allocation8 + $0xa00] sm:$0xff] %v633_v0  ;;  %v635_v2 = vld [vmem:[#allocation7 + $0x210] sm:$0xff]  ;;  %v636_v3 = vld [vmem:[#allocation7 + $0x218] sm:$0xff]  ;;  %763 = vst [vmem:[#allocation8 + $0xa08] sm:$0xff] %v634_v1 }
  0xd8   :  { %764 = vst [vmem:[#allocation8 + $0xa10] sm:$0xff] %v635_v2  ;;  %765 = vst [vmem:[#allocation8 + $0xa18] sm:$0xff] %v636_v3  ;;  %v637_v4 = vld [vmem:[#allocation7 + $0x220] sm:$0xff]  ;;  %v638_v5 = vld [vmem:[#allocation7 + $0x228] sm:$0xff] }
  0xd9   :  { %v639_v6 = vld [vmem:[#allocation7 + $0x230] sm:$0xff]  ;;  %766 = vst [vmem:[#allocation8 + $0xa20] sm:$0xff] %v637_v4  ;;  %767 = vst [vmem:[#allocation8 + $0xa28] sm:$0xff] %v638_v5  ;;  %v640_v7 = vld [vmem:[#allocation7 + $0x238] sm:$0xff] }
  0xda   :  { %768 = vst [vmem:[#allocation8 + $0xa30] sm:$0xff] %v639_v6  ;;  %v641_v8 = vld [vmem:[#allocation7 + $0x240] sm:$0xff]  ;;  %v642_v9 = vld [vmem:[#allocation7 + $0x248] sm:$0xff]  ;;  %769 = vst [vmem:[#allocation8 + $0xa38] sm:$0xff] %v640_v7 }
  0xdb   :  { %770 = vst [vmem:[#allocation8 + $0xa40] sm:$0xff] %v641_v8  ;;  %771 = vst [vmem:[#allocation8 + $0xa48] sm:$0xff] %v642_v9  ;;  %v643_v10 = vld [vmem:[#allocation7 + $0x250] sm:$0xff]  ;;  %v644_v11 = vld [vmem:[#allocation7 + $0x258] sm:$0xff] }
  0xdc   :  { %v645_v12 = vld [vmem:[#allocation7 + $0x260] sm:$0xff]  ;;  %772 = vst [vmem:[#allocation8 + $0xa50] sm:$0xff] %v643_v10  ;;  %773 = vst [vmem:[#allocation8 + $0xa58] sm:$0xff] %v644_v11  ;;  %v646_v13 = vld [vmem:[#allocation7 + $0x268] sm:$0xff] }
  0xdd   :  { %774 = vst [vmem:[#allocation8 + $0xa60] sm:$0xff] %v645_v12  ;;  %v647_v14 = vld [vmem:[#allocation7 + $0x270] sm:$0xff]  ;;  %v648_v15 = vld [vmem:[#allocation7 + $0x278] sm:$0xff]  ;;  %775 = vst [vmem:[#allocation8 + $0xa68] sm:$0xff] %v646_v13 }
  0xde   :  { %776 = vst [vmem:[#allocation8 + $0xa70] sm:$0xff] %v647_v14  ;;  %777 = vst [vmem:[#allocation8 + $0xa78] sm:$0xff] %v648_v15  ;;  %v649_v16 = vld [vmem:[#allocation7 + $0x280] sm:$0xff]  ;;  %v650_v17 = vld [vmem:[#allocation7 + $0x288] sm:$0xff] }
  0xdf   :  { %v651_v18 = vld [vmem:[#allocation7 + $0x290] sm:$0xff]  ;;  %778 = vst [vmem:[#allocation8 + $0xa80] sm:$0xff] %v649_v16  ;;  %779 = vst [vmem:[#allocation8 + $0xa88] sm:$0xff] %v650_v17  ;;  %v652_v19 = vld [vmem:[#allocation7 + $0x298] sm:$0xff] }
  0xe0   :  { %780 = vst [vmem:[#allocation8 + $0xa90] sm:$0xff] %v651_v18  ;;  %v653_v20 = vld [vmem:[#allocation7 + $0x2a0] sm:$0xff]  ;;  %v654_v21 = vld [vmem:[#allocation7 + $0x2a8] sm:$0xff]  ;;  %781 = vst [vmem:[#allocation8 + $0xa98] sm:$0xff] %v652_v19 }
  0xe1   :  { %782 = vst [vmem:[#allocation8 + $0xaa0] sm:$0xff] %v653_v20  ;;  %783 = vst [vmem:[#allocation8 + $0xaa8] sm:$0xff] %v654_v21  ;;  %v655_v22 = vld [vmem:[#allocation7 + $0x2b0] sm:$0xff]  ;;  %v656_v23 = vld [vmem:[#allocation7 + $0x2b8] sm:$0xff] }
  0xe2   :  { %v657_v24 = vld [vmem:[#allocation7 + $0x2c0] sm:$0xff]  ;;  %784 = vst [vmem:[#allocation8 + $0xab0] sm:$0xff] %v655_v22  ;;  %785 = vst [vmem:[#allocation8 + $0xab8] sm:$0xff] %v656_v23  ;;  %v658_v25 = vld [vmem:[#allocation7 + $0x2c8] sm:$0xff] }
  0xe3   :  { %786 = vst [vmem:[#allocation8 + $0xac0] sm:$0xff] %v657_v24  ;;  %v659_v26 = vld [vmem:[#allocation7 + $0x2d0] sm:$0xff]  ;;  %v660_v27 = vld [vmem:[#allocation7 + $0x2d8] sm:$0xff]  ;;  %787 = vst [vmem:[#allocation8 + $0xac8] sm:$0xff] %v658_v25 }
  0xe4   :  { %788 = vst [vmem:[#allocation8 + $0xad0] sm:$0xff] %v659_v26  ;;  %789 = vst [vmem:[#allocation8 + $0xad8] sm:$0xff] %v660_v27  ;;  %v661_v28 = vld [vmem:[#allocation7 + $0x2e0] sm:$0xff]  ;;  %v662_v29 = vld [vmem:[#allocation7 + $0x2e8] sm:$0xff] }
  0xe5   :  { %v663_v30 = vld [vmem:[#allocation7 + $0x2f0] sm:$0xff]  ;;  %790 = vst [vmem:[#allocation8 + $0xae0] sm:$0xff] %v661_v28  ;;  %791 = vst [vmem:[#allocation8 + $0xae8] sm:$0xff] %v662_v29  ;;  %v664_v31 = vld [vmem:[#allocation7 + $0x2f8] sm:$0xff] }
  0xe6   :  { %792 = vst [vmem:[#allocation8 + $0xaf0] sm:$0xff] %v663_v30  ;;  %v665_v32 = vld [vmem:[#allocation7 + $0x300] sm:$0xff]  ;;  %v666_v33 = vld [vmem:[#allocation7 + $0x308] sm:$0xff]  ;;  %793 = vst [vmem:[#allocation8 + $0xaf8] sm:$0xff] %v664_v31 }
  0xe7   :  { %794 = vst [vmem:[#allocation8 + $0xb00] sm:$0xff] %v665_v32  ;;  %795 = vst [vmem:[#allocation8 + $0xb08] sm:$0xff] %v666_v33  ;;  %v667_v34 = vld [vmem:[#allocation7 + $0x310] sm:$0xff]  ;;  %v668_v35 = vld [vmem:[#allocation7 + $0x318] sm:$0xff] }
  0xe8   :  { %v669_v36 = vld [vmem:[#allocation7 + $0x320] sm:$0xff]  ;;  %796 = vst [vmem:[#allocation8 + $0xb10] sm:$0xff] %v667_v34  ;;  %797 = vst [vmem:[#allocation8 + $0xb18] sm:$0xff] %v668_v35  ;;  %v670_v37 = vld [vmem:[#allocation7 + $0x328] sm:$0xff] }
  0xe9   :  { %798 = vst [vmem:[#allocation8 + $0xb20] sm:$0xff] %v669_v36  ;;  %v671_v38 = vld [vmem:[#allocation7 + $0x330] sm:$0xff]  ;;  %v672_v39 = vld [vmem:[#allocation7 + $0x338] sm:$0xff]  ;;  %799 = vst [vmem:[#allocation8 + $0xb28] sm:$0xff] %v670_v37 }
  0xea   :  { %800 = vst [vmem:[#allocation8 + $0xb30] sm:$0xff] %v671_v38  ;;  %801 = vst [vmem:[#allocation8 + $0xb38] sm:$0xff] %v672_v39  ;;  %v673_v40 = vld [vmem:[#allocation7 + $0x340] sm:$0xff]  ;;  %v674_v41 = vld [vmem:[#allocation7 + $0x348] sm:$0xff] }
  0xeb   :  { %v675_v42 = vld [vmem:[#allocation7 + $0x350] sm:$0xff]  ;;  %802 = vst [vmem:[#allocation8 + $0xb40] sm:$0xff] %v673_v40  ;;  %803 = vst [vmem:[#allocation8 + $0xb48] sm:$0xff] %v674_v41  ;;  %v676_v43 = vld [vmem:[#allocation7 + $0x358] sm:$0xff] }
  0xec   :  { %804 = vst [vmem:[#allocation8 + $0xb50] sm:$0xff] %v675_v42  ;;  %v677_v44 = vld [vmem:[#allocation7 + $0x360] sm:$0xff]  ;;  %v678_v45 = vld [vmem:[#allocation7 + $0x368] sm:$0xff]  ;;  %805 = vst [vmem:[#allocation8 + $0xb58] sm:$0xff] %v676_v43 }
  0xed   :  { %806 = vst [vmem:[#allocation8 + $0xb60] sm:$0xff] %v677_v44  ;;  %807 = vst [vmem:[#allocation8 + $0xb68] sm:$0xff] %v678_v45  ;;  %v679_v46 = vld [vmem:[#allocation7 + $0x370] sm:$0xff]  ;;  %v680_v47 = vld [vmem:[#allocation7 + $0x378] sm:$0xff] }
  0xee   :  { %v681_v48 = vld [vmem:[#allocation7 + $0x380] sm:$0xff]  ;;  %808 = vst [vmem:[#allocation8 + $0xb70] sm:$0xff] %v679_v46  ;;  %809 = vst [vmem:[#allocation8 + $0xb78] sm:$0xff] %v680_v47  ;;  %v682_v49 = vld [vmem:[#allocation7 + $0x388] sm:$0xff] }
  0xef   :  { %810 = vst [vmem:[#allocation8 + $0xb80] sm:$0xff] %v681_v48  ;;  %v683_v50 = vld [vmem:[#allocation7 + $0x390] sm:$0xff]  ;;  %v684_v51 = vld [vmem:[#allocation7 + $0x398] sm:$0xff]  ;;  %811 = vst [vmem:[#allocation8 + $0xb88] sm:$0xff] %v682_v49 }
  0xf0   :  { %812 = vst [vmem:[#allocation8 + $0xb90] sm:$0xff] %v683_v50  ;;  %813 = vst [vmem:[#allocation8 + $0xb98] sm:$0xff] %v684_v51  ;;  %v685_v52 = vld [vmem:[#allocation7 + $0x3a0] sm:$0xff]  ;;  %v686_v53 = vld [vmem:[#allocation7 + $0x3a8] sm:$0xff] }
  0xf1   :  { %v687_v54 = vld [vmem:[#allocation7 + $0x3b0] sm:$0xff]  ;;  %814 = vst [vmem:[#allocation8 + $0xba0] sm:$0xff] %v685_v52  ;;  %815 = vst [vmem:[#allocation8 + $0xba8] sm:$0xff] %v686_v53  ;;  %v688_v55 = vld [vmem:[#allocation7 + $0x3b8] sm:$0xff] }
  0xf2   :  { %816 = vst [vmem:[#allocation8 + $0xbb0] sm:$0xff] %v687_v54  ;;  %v689_v56 = vld [vmem:[#allocation7 + $0x3c0] sm:$0xff]  ;;  %v690_v57 = vld [vmem:[#allocation7 + $0x3c8] sm:$0xff]  ;;  %817 = vst [vmem:[#allocation8 + $0xbb8] sm:$0xff] %v688_v55 }
  0xf3   :  { %818 = vst [vmem:[#allocation8 + $0xbc0] sm:$0xff] %v689_v56  ;;  %819 = vst [vmem:[#allocation8 + $0xbc8] sm:$0xff] %v690_v57  ;;  %v691_v58 = vld [vmem:[#allocation7 + $0x3d0] sm:$0xff]  ;;  %v692_v59 = vld [vmem:[#allocation7 + $0x3d8] sm:$0xff] }
  0xf4   :  { %v693_v60 = vld [vmem:[#allocation7 + $0x3e0] sm:$0xff]  ;;  %820 = vst [vmem:[#allocation8 + $0xbd0] sm:$0xff] %v691_v58  ;;  %821 = vst [vmem:[#allocation8 + $0xbd8] sm:$0xff] %v692_v59  ;;  %v694_v61 = vld [vmem:[#allocation7 + $0x3e8] sm:$0xff] }
  0xf5   :  { %822 = vst [vmem:[#allocation8 + $0xbe0] sm:$0xff] %v693_v60  ;;  %v695_v62 = vld [vmem:[#allocation7 + $0x3f0] sm:$0xff]  ;;  %v696_v63 = vld [vmem:[#allocation7 + $0x3f8] sm:$0xff]  ;;  %823 = vst [vmem:[#allocation8 + $0xbe8] sm:$0xff] %v694_v61 }
  0xf6   :  { %824 = vst [vmem:[#allocation8 + $0xbf0] sm:$0xff] %v695_v62  ;;  %825 = vst [vmem:[#allocation8 + $0xbf8] sm:$0xff] %v696_v63 }
  0xf7   :  { %927 = shalt.err (!%p924_p0)
}
  0xf8   :  { %s928_s27 = scalar_lea.hbm %s1040_s3, 49152 }
  0xf9   :  { %p929_p1 = scmp.ne.s32.totalorder %s1040_s3, %s928_s27  ;;  %p932_p2 = scmp.lt.u32.totalorder %s928_s27, %s1040_s3 }
  0xfb   :  { %p934_p3 = pnand %p932_p2, %p929_p1 }
  0xfd   :  { %937 = shalt.err (!%p934_p3)
}
  0xfe   :  { %837 = dma.vmem_to_hbm [thread:$0]  %s832_s21, 49152, %s1040_s3, [#allocation4], %s946_s24, %s946_s24, %s947_s25  }
  0xff   :  { %942 = dma.done.wait [#allocation4], 49152  }
 0x100   :  { %943 = vsyncadd [#allocation4], 4294918144 }
 0x101   :  { %841 = vsyncpa [#allocation3], 1 }
 0x102   :  { %842 = vsyncpa [#allocation6], 1 }
 0x103   :  { %843 = vsyncpa [#allocation4], 1 }

</bundles_post_ra>
